<compile_context>
chip_gen: v7x
topology: tpu7x:2x2x1
jax: 0.10.0
libtpu: 0.0.40
codegen_flags: <defaults>
</compile_context>

<pallas_src>
import numpy as np
import jax
import jax.numpy as jnp
from jax.experimental import pallas as pl
from jax.experimental.pallas import tpu as pltpu


# ---------------------------------------------------------------------------
# Kernels
# ---------------------------------------------------------------------------

def _upsample_uniform_kernel(x_ref, sel_ref, o_ref):
    # One MXU selection matmul: (BR, kp*W) @ (kp*W, kp*srow*OW) -> (BR, kp*srow*OW).
    o_ref[...] = jnp.dot(
        x_ref[...], sel_ref[...],
        preferred_element_type=o_ref.dtype,
        precision=jax.lax.Precision.HIGHEST,
    )


def _upsample_general_kernel(x_ref, r_ref, c_ref, o_ref):
    # Fallback (non-integer scale): per-image column matmul then row matmul.
    t = jnp.dot(x_ref[0], c_ref[...],
                preferred_element_type=jnp.float32,
                precision=jax.lax.Precision.HIGHEST)
    out = jnp.dot(r_ref[...], t.astype(r_ref.dtype),
                  preferred_element_type=jnp.float32,
                  precision=jax.lax.Precision.HIGHEST)
    o_ref[0] = out.astype(o_ref.dtype)


# ---------------------------------------------------------------------------
# Sizing helpers
# ---------------------------------------------------------------------------

def _divisors(n):
    ds = set()
    i = 1
    while i * i <= n:
        if n % i == 0:
            ds.add(i)
            ds.add(n // i)
        i += 1
    return sorted(ds)


def _vmem_plan():
    """Generation-aware VMEM sizing and grid-step target."""
    try:
        cap = int(pltpu.get_tpu_info().vmem_capacity_bytes)
    except Exception:
        cap = 64 << 20                      # conservative (v7x-sized) fallback
    budget = int(cap * 0.55)                # for block sizing
    limit = int(cap * 0.75)                 # vmem_limit_bytes (compiler headroom)
    # 64 MiB-VMEM parts (v7x-class) have 2 TensorCores sharing the grid axis ->
    # keep >= 4 steps; 128 MiB single-TC parts (v5e/v6e) only need >= 2 steps
    # for DMA/compute overlap.
    min_steps = 4 if cap <= (80 << 20) else 2
    return budget, limit, min_steps


def _pick_block_rows(nrv, win, wout, itemsize, sel_bytes, budget, min_steps):
    """Largest divisor of nrv that is sublane-legal, fits the budget, and
    leaves at least `min_steps` grid steps when possible."""
    sub = {1: 32, 2: 16}.get(itemsize, 8)   # dtype-aware sublane multiple

    def valid(d):
        return (d % sub == 0) or (d == nrv)

    def fits(d):
        # double-buffered x/out blocks + double-buffered shared selector
        return 2 * d * (win + wout) * itemsize + 2 * sel_bytes <= budget

    cands = [d for d in _divisors(nrv) if valid(d)]
    fitting = [d for d in cands if fits(d)]
    if not fitting:
        return min(cands)
    br = max(fitting)
    while nrv // br < min(min_steps, nrv):
        smaller = [d for d in fitting if d < br]
        if not smaller:
            break
        br = max(smaller)
    return br


# ---------------------------------------------------------------------------
# Wrapper
# ---------------------------------------------------------------------------

def upsample_nearest(x, scale):
    """Equivalent of UpSample(scale).forward(x) for NCHW input (mode='nearest')."""
    N, C, H, W = x.shape
    if isinstance(scale, (tuple, list)):
        sh, sw = scale
    else:
        sh = sw = scale
    OH = int(np.floor(H * sh))
    OW = int(np.floor(W * sw))
    NC = N * C

    # PyTorch 'nearest' source index: src = floor(dst * in / out).
    src_r = np.minimum((np.arange(OH) * H) // OH, H - 1)
    src_c = np.minimum((np.arange(OW) * W) // OW, W - 1)

    orig_dtype = x.dtype
    if jnp.issubdtype(orig_dtype, jnp.floating):
        comp = orig_dtype
    else:
        # TODO(synk): integer inputs ride the f32 selection matmul; exact only
        # for |x| < 2**24.
        comp = jnp.float32
    xc = x.astype(comp)
    itemsize = np.dtype(comp).itemsize

    budget, vmem_limit, min_steps = _vmem_plan()
    Cm = (np.arange(W)[:, None] == src_c[None, :]).astype(np.float32)   # (W, OW)

    if OH % H == 0:
        # --- Optimized path: uniform row repeat (covers integer scale factors).
        srow = OH // H
        NR = NC * H

        # Lane-dense packing factor: pack kp image rows per kernel row.
        divs = _divisors(NR)
        want = max(1, -(-128 // W)) if W < 128 else 1
        cands_ge = [d for d in divs if want <= d <= 8 * want]
        kp = min(cands_ge) if cands_ge else max([d for d in divs if d <= want],
                                                default=1)

        WIN = kp * W
        WOUT = kp * srow * OW
        NRv = NR // kp

        # Selector: out_view = x_view @ kron(I_kp, tile(Cm, (1, srow))).
        Cbig = np.tile(Cm, (1, srow))                                    # (W, srow*OW)
        sel_np = np.kron(np.eye(kp, dtype=np.float32), Cbig)             # (WIN, WOUT)
        sel_bytes = sel_np.size * itemsize

        BR = _pick_block_rows(NRv, WIN, WOUT, itemsize, sel_bytes,
                              budget, min_steps)
        grid = (NRv // BR,)

        x2 = xc.reshape(NRv, WIN)                                        # free view
        out2 = pl.pallas_call(
            _upsample_uniform_kernel,
            out_shape=jax.ShapeDtypeStruct((NRv, WOUT), comp),
            grid_spec=pltpu.PrefetchScalarGridSpec(
                num_scalar_prefetch=0,
                grid=grid,
                in_specs=[
                    pl.BlockSpec((BR, WIN), lambda i: (i, 0)),
                    # Shared selector: same block every step -> fetched once.
                    pl.BlockSpec((WIN, WOUT), lambda i: (0, 0)),
                ],
                out_specs=pl.BlockSpec((BR, WOUT), lambda i: (i, 0)),
            ),
            compiler_params=pltpu.CompilerParams(
                dimension_semantics=("parallel",),
                vmem_limit_bytes=vmem_limit,
            ),
        )(x2, jnp.asarray(sel_np, dtype=comp))
        out = out2.reshape(N, C, OH, OW)
    else:
        # --- Fallback: non-uniform row mapping (non-integer scale factor).
        R = (src_r[:, None] == np.arange(H)[None, :]).astype(np.float32)  # (OH, H)
        x3 = xc.reshape(NC, H, W)
        out3 = pl.pallas_call(
            _upsample_general_kernel,
            out_shape=jax.ShapeDtypeStruct((NC, OH, OW), comp),
            grid_spec=pltpu.PrefetchScalarGridSpec(
                num_scalar_prefetch=0,
                grid=(NC,),
                in_specs=[
                    pl.BlockSpec((1, H, W), lambda i: (i, 0, 0)),
                    pl.BlockSpec((OH, H), lambda i: (0, 0)),
                    pl.BlockSpec((W, OW), lambda i: (0, 0)),
                ],
                out_specs=pl.BlockSpec((1, OH, OW), lambda i: (i, 0, 0)),
            ),
            compiler_params=pltpu.CompilerParams(
                dimension_semantics=("parallel",),
                vmem_limit_bytes=vmem_limit,
            ),
        )(x3, jnp.asarray(R, dtype=comp), jnp.asarray(Cm, dtype=comp))
        out = out3.reshape(N, C, OH, OW)

    return out.astype(orig_dtype)


if __name__ == "__main__":
    key = jax.random.PRNGKey(0)
    x = jax.random.normal(key, (2, 4, 16, 16), dtype=jnp.float32)  # NCHW
    scale = 2

    y = upsample_nearest(x, scale)
    y = jax.block_until_ready(y)

    # Reference semantics (integer-scale nearest == interleaved repeat).
    ref = jnp.repeat(jnp.repeat(x, scale, axis=2), scale, axis=3)
    assert y.shape == (2, 4, 32, 32), y.shape
    np.testing.assert_allclose(np.asarray(y), np.asarray(ref), rtol=0, atol=0)

    print("KERNEL_OK")
</pallas_src>

<mosaic_0001>
module attributes {stable_mosaic.version = 11 : i64} {
  func.func @_upsample_uniform_kernel(%arg0: i32, %arg1: memref<8x128xf32, #tpu.memory_space<vmem>>, %arg2: memref<128x512xf32, #tpu.memory_space<vmem>>, %arg3: memref<8x512xf32, #tpu.memory_space<vmem>>) attributes {dimension_semantics = [#tpu.dimension_semantics<parallel>], iteration_bounds = array<i64: 2>, scalar_prefetch = 0 : i64, scratch_operands = 0 : i64, tpu.core_type = #tpu.core_type<tc>, window_params = [{transform_indices = @transform_0, window_bounds = array<i64: 8, 128>}, {pipeline_mode = #tpu.pipeline_mode<synchronous>, transform_indices = @transform_1, window_bounds = array<i64: 128, 512>}, {transform_indices = @transform_2, window_bounds = array<i64: 8, 512>}]} {
    %c0 = arith.constant 0 : index
    %c0_0 = arith.constant 0 : index
    %0 = vector.load %arg1[%c0, %c0_0] : memref<8x128xf32, #tpu.memory_space<vmem>>, vector<8x128xf32>
    %c0_1 = arith.constant 0 : index
    %c0_2 = arith.constant 0 : index
    %1 = vector.load %arg2[%c0_1, %c0_2] : memref<128x512xf32, #tpu.memory_space<vmem>>, vector<128x512xf32>
    %cst = arith.constant dense<0.000000e+00> : vector<8x512xf32>
    %2 = tpu.matmul %0, %1, %cst {dimension_numbers = #tpu.dot_dimension_numbers<[1], [0], [0], [1], [0, 0, 1, 1], [], []>, precision = #tpu.contract_precision<fp32>} : vector<8x128xf32>, vector<128x512xf32>, vector<8x512xf32> -> vector<8x512xf32>
    %c0_3 = arith.constant 0 : index
    %c0_4 = arith.constant 0 : index
    %3 = vector.load %arg3[%c0_3, %c0_4] : memref<8x512xf32, #tpu.memory_space<vmem>>, vector<8x512xf32>
    tpu.vector_store %arg3[%c0_3, %c0_4], %2 {strides = array<i32>} : memref<8x512xf32, #tpu.memory_space<vmem>>, vector<8x512xf32>,
    return
  }
  func.func @transform_0(%arg0: i32) -> (i32, i32) {
    %c0_i32 = arith.constant 0 : i32
    %c0_i32_0 = arith.constant 0 : i32
    return %arg0, %c0_i32 : i32, i32
  }
  func.func @transform_1(%arg0: i32) -> (i32, i32) {
    %c0_i32 = arith.constant 0 : i32
    %c0_i32_0 = arith.constant 0 : i32
    %c0_i32_1 = arith.constant 0 : i32
    return %c0_i32, %c0_i32_0 : i32, i32
  }
  func.func @transform_2(%arg0: i32) -> (i32, i32) {
    %c0_i32 = arith.constant 0 : i32
    %c0_i32_0 = arith.constant 0 : i32
    return %arg0, %c0_i32 : i32, i32
  }
}

</mosaic_0001>

<bundles_post_ra>
// kernel: tpu_custom_call.1
= control target key start
LH: loop header
LB: loop body
LE: loop exit
PB: predicated region body
PF: predicated region fallthrough
CT: control target
= control target key end

     0   :  { %7 = vsyncpa [#allocation3], 0  ;;  %s3740_s0 = inlined_call_operand.hbm [shape: f32[16,128], index: 0, kind: input, shape index: {}]   ;;  %s3741_s1 = inlined_call_operand.hbm [shape: f32[128,512], index: 1, kind: input, shape index: {}]   ;;  %s3742_s2 = inlined_call_operand.hbm [shape: f32[16,512], index: 2, kind: output, shape index: {}]  }
   0x1   :  { %9 = vsyncpa [#allocation3 + $0x1], 0 }
   0x2   :  { %10 = vsyncpa [#allocation6], 0 }
   0x3   :  { %11 = vsyncpa [#allocation4], 0 }
   0x4   :  { %13 = vsyncpa [#allocation4 + $0x1], 0  ;;  %s2679_s9 = smov 0   ;;  %s2681_s10 = smov 0  }
   0x5   :  { %s2683_s11 = smov 0   ;;  %s2685_s12 = smov 0  }
   0x6 LB: > { %s2700_s13 = sadd.s32 4294967295, %s2656_s12   ;;  %s2048_s14 = sadd.s32 4294967294, %s2656_s12   ;;  %s2656_s12 = sphi %s2685_s12, %s4194_s12   ;;  %s2652_s11 = sphi %s2683_s11, %s4193_s11   ;;  %s2648_s10 = sphi %s2681_s10, %s4192_s10   ;;  %s2644_s9 = sphi %s2679_s9, %s4191_s9  }
   0x7   : > { %p39_p0 = scmp.ne.s32.totalorder %s2648_s10, %s2644_s9  ;;  %p3743_p1 = scmp.eq.s32.totalorder %s2700_s13, 0 }
   0x8   : > { %p90_p3 = scmp.eq.s32.totalorder %s2048_s14, 1  ;;  %p2049_p5 = scmp.ge.s32.totalorder %s2656_s12, 1 }
   0x9   : > { %p2709_p4 = por %p3743_p1, %p39_p0  ;;  %p97_p7 = scmp.lt.s32.totalorder %s2656_s12, 3 }
   0xa   : > { %p2714_p6 = por %p90_p3, %p39_p0  ;;  %s2658_s18 = smov [#allocation5]  }
   0xb   : > { %s3942_s15 = scalar_select %p2709_p4, 1, 0 }
   0xc   : > { %s3943_s16 = scalar_select %p2714_p6, 1, 0 }
   0xd   : > { %p2719_p8 = pnand %p2049_p5, %p97_p7  ;;  %s109_s19 = sshll.u32 %s2658_s18, 4  ;;  %s2723_s19 = int_to_ptr.vmem [resolvable:$true] %s109_s19 }
   0xe   : > { %s2735_s21 = sadd.s32 1, %s2656_s12   ;;  %s26_s22 = sadd.s32 1, %s2652_s11 }
   0xf   : > { %s3944_s17 = scalar_select %p2719_p8, 1, 0 }
  0x10   : > { %p2476_p9 = pneg %p2719_p8  ;;  %s23_s23 = ssub.s32 %s2656_s12, %s2735_s21 }
  0x11   : > { %s2528_s26 = scalar_lea.hbm %s3741_s1, 8192 }
  0x12   : > { %p2730_p11 = pnand %p2476_p9, %p3743_p1  ;;  %p2529_p12 = scmp.ne.s32.totalorder %s3741_s1, %s2528_s26 }
  0x13   : > { %p2535_p5 = scmp.lt.u32.totalorder %s2528_s26, %s3741_s1 }
  0x14   : > { %p2530_p13 = pneg %p2730_p11 }
  0x16   : > { %p2531_p0 = pnand %p2530_p13, %p2529_p12 }
  0x18   : > { %p2532_p3 = pneg %p2531_p0 }
  0x1a   : > { %p2537_p7 = pnand %p2535_p5, %p2532_p3 }
  0x1c   : > { %2540 = shalt.err (!%p2537_p7)
}
  0x1d   : > { %s2541_s3 = scalar_lea.vmem %s2723_s19, 8192  ;;  %p2549_p2 = scmp.lt.s32.totalorder %s2723_s19, %s2723_s19 }
  0x1e   : > { %p2542_p9 = scmp.ne.s32.totalorder %s2723_s19, %s2541_s3  ;;  %p2550_p6 = scmp.lt.s32.totalorder %s2541_s3, %s2541_s3 }
  0x20   : > { %p2544_p10 = pnand %p2542_p9, %p2530_p13  ;;  %p2551_p4 = por %p2550_p6, %p2549_p2 }
  0x22   : > { %p2545_p1 = pneg %p2544_p10 }
  0x24   : > { %p2552_p8 = pnand %p2551_p4, %p2545_p1 }
  0x26   : > { %2555 = shalt.err (!%p2552_p8)
}
  0x27   : > { %s2659_s4 = smov 512   ;;  %s2660_s5 = smov 32  }
  0x28   : > { %2479 = dma.hbm_to_vmem [thread:$0]  (!%p2730_p11), %s3741_s1, 8192, %s2723_s19, [#allocation6], %s2659_s4, %s2659_s4, %s2660_s5  }
  0x29   : > { %p24_p2 = scmp.eq.s32.totalorder %s23_s23, 0  ;;  %p33_p1 = scmp.ne.s32.totalorder %s2652_s11, %s2648_s10 }
  0x2a   : > { %p34_p4 = scmp.eq.s32.totalorder %s2656_s12, 0  ;;  %p2489_p6 = scmp.lt.s32.totalorder %s2656_s12, 2 }
  0x2b   : > { %s2766_s8 = scalar_select %p24_p2, %s2652_s11, %s26_s22  }
  0x2c   : > { %p35_p8 = por %p34_p4, %p33_p1  ;;  %p3946_p10 = scmp.eq.s32.totalorder %s2700_s13, 1 }
  0x2d   : > { %s123_s18 = sand.u32 1, %s2652_s11   ;;  %s2053_s24 = sshll.u32 %s2656_s12, 7 }
  0x2e   : > { %p2770_p12 = por %p3946_p10, %p33_p1  ;;  %s2052_s25 = sshll.u32 %s123_s18, 3 }
  0x2f   : > { %s2779_s27 = scalar_lea.hbm %s3740_s0, %s2053_s24  ;;  %s127_s19 = scalar_lea.vmem [#allocation2], %s2052_s25 }
  0x30   : > { %s134_s22 = sshll.u32 %s127_s19, 4  ;;  %p2781_p11 = pnand %p2489_p6, %p35_p8  ;;  %s2785_s22 = int_to_ptr.vmem [resolvable:$true] %s134_s22 }
  0x31   : > { %s124_s28 = scalar_lea.sflag [#allocation3], %s123_s18  ;;  %s2556_s29 = scalar_lea.hbm %s2779_s27, 128 }
  0x32   : > { %p2557_p13 = scmp.ne.s32.totalorder %s2779_s27, %s2556_s29  ;;  %p2558_p0 = pneg %p2781_p11 }
  0x33   : > { %s2561_s4 = scalar_lea.hbm %s3740_s0, 256  ;;  %p2562_p7 = scmp.lt.u32.totalorder %s2779_s27, %s3740_s0 }
  0x34   : > { %p2559_p3 = pnand %p2558_p0, %p2557_p13  ;;  %p2563_p9 = scmp.lt.u32.totalorder %s2561_s4, %s2556_s29 }
  0x35   : > { %p2565_p1 = scmp.lt.u32.totalorder %s2556_s29, %s2779_s27 }
  0x36   : > { %p2560_p5 = pneg %p2559_p3  ;;  %p2564_p2 = por %p2563_p9, %p2562_p7 }
  0x38   : > { %p2566_p4 = por %p2565_p1, %p2564_p2 }
  0x3a   : > { %p2567_p6 = pnand %p2566_p4, %p2560_p5 }
  0x3c   : > { %2570 = shalt.err (!%p2567_p6)
}
  0x3d   : > { %s2571_s7 = scalar_lea.vmem %s2785_s22, 128  ;;  %s2661_s18 = smov [#allocation2]  }
  0x3e   : > { %p2572_p8 = scmp.ne.s32.totalorder %s2785_s22, %s2571_s7  ;;  %s2576_s24 = sshll.u32 %s2661_s18, 4  ;;  %s2577_s24 = int_to_ptr.vmem [resolvable:$false] %s2576_s24 }
  0x3f   : > { %s2578_s25 = scalar_lea.vmem %s2577_s24, 256  ;;  %p2579_p3 = scmp.lt.s32.totalorder %s2785_s22, %s2577_s24 }
  0x40   : > { %p2574_p10 = pnand %p2572_p8, %p2558_p0  ;;  %p2580_p7 = scmp.lt.s32.totalorder %s2578_s25, %s2571_s7 }
  0x42   : > { %p2575_p13 = pneg %p2574_p10  ;;  %p2581_p9 = por %p2580_p7, %p2579_p3 }
  0x44   : > { %p2582_p2 = pnand %p2581_p9, %p2575_p13 }
  0x46   : > { %2585 = shalt.err (!%p2582_p2)
}
  0x47   : > { %2483 = dma.hbm_to_vmem [thread:$0]  (!%p2781_p11), %s2779_s27, 128, %s2785_s22, %s124_s28  }
  0x48   : > { %p3949_p5 = scmp.ne.s32.totalorder %s3944_s17, 0 }
  0x4a   : > { %143 = sbr.rel (%p3949_p5) target bundleno = 560 (0x230), region = 28 }
  0x51   : > { %s2815_s20 = sand.u32 1, %s2648_s10   ;;  %p3950_p0 = scmp.ne.s32.totalorder %s3942_s15, 0 }
  0x52   : > { %s2055_s26 = sshll.u32 %s2815_s20, 3  ;;  %s146_s19 = scalar_lea.sflag [#allocation3], %s2815_s20 }
  0x53   : > { %s2819_s29 = scalar_lea.vmem [#allocation2], %s2055_s26 }
  0x54   : > { %2631 = dma.done.wait (%p3950_p0), %s146_s19, 128  }
  0x55   : > { %2633 = vsyncadd (%p3950_p0), %s146_s19, 4294967168  ;;  %p3951_p11 = scmp.eq.s32.totalorder %s2700_s13, 0 }
  0x57   : > { %2635 = dma.done.wait (%p3951_p11), [#allocation6], 8192   ;;  %p3952_p1 = pmov %p3951_p11 }
  0x58   : > { %v3746_v0 = vmov 0.0   ;;  %v176_v1 = vld [vmem:[#allocation5 + $0x8] sm:$0xff]  ;;  %v178_v3 = vld [vmem:[#allocation5 + $0x18] sm:$0xff]  ;;  %v175_v8 = vld [vmem:[#allocation5] sm:$0xff]  ;;  %s2057_s15 = sshll.u32 %s2815_s20, 5  ;;  %s2063_s22 = sshll.u32 %s2700_s13, 9 }
  0x59   : > { %2637 = vsyncadd (%p3952_p1), [#allocation6], 4294959104  ;;  %335 = vmatprep.mubr.f32.mxu0 %v3746_v0  ;;  %1190 = vmatprep.mubr.f32.mxu1 %v3746_v0  ;;  %v180_v2 = vld [vmem:[#allocation5 + $0x28] sm:$0xff]  ;;  %v239_v4 = vand.u32 4294901760, %v176_v1  ;;  %v182_v6 = vld [vmem:[#allocation5 + $0x38] sm:$0xff]  ;;  %v1094_v7 = vand.u32 4294901760, %v178_v3  ;;  %s3698_s30 = scalar_lea.hbm %s3742_s2, %s2063_s22 }
  0x5a   : > { %v243_v5 = vand.u32 4294901760, %v180_v2  ;;  %v179_v9 = vld [vmem:[#allocation5 + $0x20] sm:$0xff]  ;;  %v1098_v10 = vand.u32 4294901760, %v182_v6  ;;  %v241_v11 = vand.u32 4294901760, %v175_v8  ;;  %v177_v13 = vld [vmem:[#allocation5 + $0x10] sm:$0xff]  ;;  %v184_v15 = vld [vmem:[#allocation5 + $0x48] sm:$0xff] }
  0x5b   : > { %v245_v12 = vand.u32 4294901760, %v179_v9  ;;  %v181_v14 = vld [vmem:[#allocation5 + $0x30] sm:$0xff]  ;;  %v2833_v17 = vsub.f32 %v176_v1, %v239_v4  ;;  %v2837_v19 = vsub.f32 %v178_v3, %v1094_v7  ;;  %v188_v20 = vld [vmem:[#allocation5 + $0x68] sm:$0xff]  ;;  %v186_v21 = vld [vmem:[#allocation5 + $0x58] sm:$0xff]  ;;  %v1096_v29 = vand.u32 4294901760, %v177_v13  ;;  %s173_s17 = scalar_lea.vmem [#allocation7], %s2057_s15 }
  0x5c   : > { %v2831_v16 = vpack.c.bf16 %v243_v5, %v239_v4  ;;  %v2835_v18 = vsub.f32 %v180_v2, %v243_v5  ;;  %v190_v22 = vld [vmem:[#allocation5 + $0x78] sm:$0xff]  ;;  %v2839_v23 = vpack.c.bf16 %v1098_v10, %v1094_v7  ;;  %v2841_v24 = vsub.f32 %v182_v6, %v1098_v10  ;;  %v183_v27 = vld [vmem:[#allocation5 + $0x40] sm:$0xff]  ;;  %v185_v37 = vld [vmem:[#allocation5 + $0x50] sm:$0xff]  ;;  %s1968_s27 = sshll.u32 %s173_s17, 4  ;;  %s1954_s3 = scalar_lea.sflag [#allocation4], %s2815_s20  ;;  %s3693_s27 = int_to_ptr.vmem [resolvable:$true] %s1968_s27 }
  0x5d   : > { %3954 = vst [vmem:[#allocation12_spill] sm:$0xff] %v2833_v17  ;;  %3956 = vst [vmem:[#allocation14_spill] sm:$0xff] %v2837_v19  ;;  %v2843_v25 = vpack.c.bf16 %v245_v12, %v241_v11  ;;  %v2845_v26 = vsub.f32 %v175_v8, %v241_v11  ;;  %v2848_v28 = vsub.f32 %v179_v9, %v245_v12  ;;  %v1100_v30 = vand.u32 4294901760, %v181_v14  ;;  %v187_v32 = vld [vmem:[#allocation5 + $0x60] sm:$0xff]  ;;  %v189_v38 = vld [vmem:[#allocation5 + $0x70] sm:$0xff]  ;;  %s2586_s4 = scalar_lea.vmem %s3693_s27, 512 }
  0x5e   : > { %3953 = vst [vmem:[#allocation11_spill] sm:$0xff] %v2831_v16  ;;  %3955 = vst [vmem:[#allocation13_spill] sm:$0xff] %v2835_v18  ;;  %2065 = vmatprep.subr.bf16.mxu0 %v2831_v16  ;;  %v247_v31 = vand.u32 4294901760, %v184_v15  ;;  %2257 = vmatprep.subr.bf16.mxu1 %v2839_v23  ;;  %v251_v33 = vand.u32 4294901760, %v188_v20  ;;  %v1102_v34 = vand.u32 4294901760, %v186_v21  ;;  %v1106_v35 = vand.u32 4294901760, %v190_v22  ;;  %p2587_p4 = scmp.ne.s32.totalorder %s3693_s27, %s2586_s4 }
  0x5f   : > { %3957 = vst [vmem:[#allocation15_spill] sm:$0xff] %v2839_v23  ;;  %3958 = vst [vmem:[#allocation16_spill] sm:$0xff] %v2841_v24  ;;  %2067 = vmatpush1.bf16.msra.mxu0 %v2843_v25  ;;  %v249_v36 = vand.u32 4294901760, %v183_v27  ;;  %v2852_v39 = vpack.c.bf16 %v1100_v30, %v1096_v29  ;;  %v2854_v40 = vsub.f32 %v177_v13, %v1096_v29  ;;  %v192_v43 = vld [vmem:[#allocation5 + $0x88] sm:$0xff]  ;;  %v194_v45 = vld [vmem:[#allocation5 + $0x98] sm:$0xff]  ;;  %v253_v52 = vand.u32 4294901760, %v187_v32 }
  0x60   : > { %3959 = vst [vmem:[#allocation17_spill] sm:$0xff] %v2843_v25  ;;  %3960 = vst [vmem:[#allocation18_spill] sm:$0xff] %v2848_v28  ;;  %v2856_v41 = vsub.f32 %v181_v14, %v1100_v30  ;;  %v2858_v42 = vsub.f32 %v184_v15, %v247_v31  ;;  %v196_v44 = vld [vmem:[#allocation5 + $0xa8] sm:$0xff]  ;;  %v2860_v46 = vpack.c.bf16 %v251_v33, %v247_v31  ;;  %v198_v50 = vld [vmem:[#allocation5 + $0xb8] sm:$0xff]  ;;  %v1104_v54 = vand.u32 4294901760, %v185_v37  ;;  %p2588_p6 = pnand %p2587_p4, %p2770_p12  ;;  %s2663_s13 = smov [#allocation7]  }
  0x61   : > { %3961 = vst [vmem:[#allocation19_spill] sm:$0xff] %v2852_v39  ;;  %v2862_v47 = vsub.f32 %v188_v20, %v251_v33  ;;  %v2864_v48 = vpack.c.bf16 %v1106_v35, %v1102_v34  ;;  %v2866_v49 = vsub.f32 %v186_v21, %v1102_v34  ;;  %2259 = vmatpush1.bf16.msra.mxu1 %v2852_v39  ;;  %v1108_v55 = vand.u32 4294901760, %v189_v38  ;;  %v191_v59 = vld [vmem:[#allocation5 + $0x80] sm:$0xff]  ;;  %v193_v2 = vld [vmem:[#allocation5 + $0x90] sm:$0xff]  ;;  %v200_v4 = vld [vmem:[#allocation5 + $0xc8] sm:$0xff]  ;;  %s2590_s5 = sshll.u32 %s2663_s13, 4  ;;  %s2591_s5 = int_to_ptr.vmem [resolvable:$false] %s2590_s5 }
  0x62   : > { %3962 = vst [vmem:[#allocation20_spill] sm:$0xff] %v2860_v46  ;;  %v2869_v51 = vsub.f32 %v190_v22, %v1106_v35  ;;  %v2871_v53 = vsub.f32 %v183_v27, %v249_v36  ;;  %2069 = vmatprep.subr.bf16.mxu0 %v2860_v46  ;;  %v255_v56 = vand.u32 4294901760, %v192_v43  ;;  %v259_v57 = vand.u32 4294901760, %v196_v44  ;;  %v195_v60 = vld [vmem:[#allocation5 + $0xa0] sm:$0xff]  ;;  %v197_v3 = vld [vmem:[#allocation5 + $0xb0] sm:$0xff]  ;;  %v204_v9 = vld [vmem:[#allocation5 + $0xe8] sm:$0xff]  ;;  %p2589_p8 = pneg %p2588_p6  ;;  %p2593_p10 = scmp.lt.s32.totalorder %s3693_s27, %s2591_s5 }
  0x63   : > { %3963 = vst [vmem:[#allocation21_spill] sm:$0xff] %v2864_v48  ;;  %2261 = vmatprep.subr.bf16.mxu1 %v2864_v48  ;;  %v1110_v58 = vand.u32 4294901760, %v194_v45  ;;  %v2875_v61 = vpack.c.bf16 %v253_v52, %v249_v36  ;;  %v2877_v62 = vsub.f32 %v187_v32, %v253_v52  ;;  %v2879_v63 = vsub.f32 %v185_v37, %v1104_v54  ;;  %v202_v10 = vld [vmem:[#allocation5 + $0xd8] sm:$0xff]  ;;  %v199_v33 = vld [vmem:[#allocation5 + $0xc0] sm:$0xff]  ;;  %v217_v39 = vld [vmem:[#allocation5 + $0x150] sm:$0xff]  ;;  %s2592_s6 = scalar_lea.vmem %s2591_s5, 1024 }
  0x64   : > { %v1114_v1 = vand.u32 4294901760, %v198_v50  ;;  %v2881_v5 = vpack.c.bf16 %v1108_v55, %v1104_v54  ;;  %v2883_v6 = vsub.f32 %v189_v38, %v1108_v55  ;;  %v2885_v7 = vpack.c.bf16 %v259_v57, %v255_v56  ;;  %v206_v11 = vld [vmem:[#allocation5 + $0xf8] sm:$0xff]  ;;  %v203_v38 = vld [vmem:[#allocation5 + $0xe0] sm:$0xff]  ;;  %v208_v55 = vld [vmem:[#allocation5 + $0x108] sm:$0xff]  ;;  %p2594_p13 = scmp.lt.s32.totalorder %s2592_s6, %s2586_s4 }
  0x65   : > { %3964 = vst [vmem:[#allocation22_spill] sm:$0xff] %v2875_v61  ;;  %v2887_v8 = vsub.f32 %v192_v43, %v255_v56  ;;  %2071 = vmatpush1.bf16.msra.mxu0 %v2875_v61  ;;  %v2890_v12 = vsub.f32 %v196_v44, %v259_v57  ;;  %v2894_v14 = vsub.f32 %v194_v45, %v1110_v58  ;;  %v257_v20 = vand.u32 4294901760, %v191_v59  ;;  %v201_v43 = vld [vmem:[#allocation5 + $0xd0] sm:$0xff]  ;;  %v212_v56 = vld [vmem:[#allocation5 + $0x128] sm:$0xff]  ;;  %v210_v57 = vld [vmem:[#allocation5 + $0x118] sm:$0xff] }
  0x66   : > { %3965 = vst [vmem:[#allocation23_spill] sm:$0xff] %v2881_v5  ;;  %3966 = vst [vmem:[#allocation24_spill] sm:$0xff] %v2885_v7  ;;  %v2892_v13 = vpack.c.bf16 %v1114_v1, %v1110_v58  ;;  %v2896_v15 = vsub.f32 %v198_v50, %v1114_v1  ;;  %2263 = vmatpush1.bf16.msra.mxu1 %v2881_v5  ;;  %2073 = vmatprep.subr.bf16.mxu0 %v2885_v7  ;;  %v261_v21 = vand.u32 4294901760, %v195_v60  ;;  %v205_v44 = vld [vmem:[#allocation5 + $0xf0] sm:$0xff]  ;;  %v211_v0 = vld [vmem:[#allocation5 + $0x120] sm:$0xff]  ;;  %p2595_p3 = por %p2594_p13, %p2593_p10 }
  0x67   : > { %v1112_v22 = vand.u32 4294901760, %v193_v2  ;;  %v1116_v27 = vand.u32 4294901760, %v197_v3  ;;  %v263_v29 = vand.u32 4294901760, %v200_v4  ;;  %v267_v30 = vand.u32 4294901760, %v204_v9  ;;  %v218_v48 = vld [vmem:[#allocation5 + $0x158] sm:$0xff]  ;;  %v221_v16 = vld [vmem:[#allocation5 + $0x170] sm:$0xff] }
  0x68   : > { %3967 = vst [vmem:[#allocation25_spill] sm:$0xff] %v2892_v13  ;;  %2265 = vmatprep.subr.bf16.mxu1 %v2892_v13  ;;  %v1118_v31 = vand.u32 4294901760, %v202_v10  ;;  %v1122_v32 = vand.u32 4294901760, %v206_v11  ;;  %v2901_v34 = vpack.c.bf16 %v261_v21, %v257_v20  ;;  %v2903_v35 = vsub.f32 %v191_v59, %v257_v20  ;;  %v220_v13 = vld [vmem:[#allocation5 + $0x168] sm:$0xff]  ;;  %p2596_p7 = pnand %p2595_p3, %p2589_p8 }
  0x69   : > { %v2905_v36 = vsub.f32 %v195_v60, %v261_v21  ;;  %v2907_v37 = vpack.c.bf16 %v1116_v27, %v1112_v22  ;;  %v2909_v45 = vsub.f32 %v193_v2, %v1112_v22  ;;  %v2911_v50 = vsub.f32 %v197_v3, %v1116_v27  ;;  %v214_v21 = vld [vmem:[#allocation5 + $0x138] sm:$0xff] }
  0x6a   : > { %3968 = vst [vmem:[#allocation26_spill] sm:$0xff] %v2901_v34  ;;  %v2913_v52 = vpack.c.bf16 %v267_v30, %v263_v29  ;;  %v2915_v54 = vsub.f32 %v200_v4, %v263_v29  ;;  %2075 = vmatpush1.bf16.msra.mxu0 %v2901_v34  ;;  %v2919_v58 = vsub.f32 %v204_v9, %v267_v30  ;;  %v265_v1 = vand.u32 4294901760, %v199_v33  ;;  %v207_v30 = vld [vmem:[#allocation5 + $0x100] sm:$0xff]  ;;  %v216_v34 = vld [vmem:[#allocation5 + $0x148] sm:$0xff] }
  0x6b   : > { %3969 = vst [vmem:[#allocation27_spill] sm:$0xff] %v2907_v37  ;;  %2267 = vmatpush1.bf16.msra.mxu1 %v2907_v37  ;;  %v2921_v59 = vpack.c.bf16 %v1122_v32, %v1118_v31  ;;  %v2923_v60 = vsub.f32 %v202_v10, %v1118_v31  ;;  %v2926_v2 = vsub.f32 %v206_v11, %v1122_v32  ;;  %v269_v3 = vand.u32 4294901760, %v203_v38  ;;  %v209_v10 = vld [vmem:[#allocation5 + $0x110] sm:$0xff] }
  0x6c   : > { %3970 = vst [vmem:[#allocation28_spill] sm:$0xff] %v2913_v52  ;;  %2077 = vmatprep.subr.bf16.mxu0 %v2913_v52  ;;  %v1120_v4 = vand.u32 4294901760, %v201_v43  ;;  %v1124_v20 = vand.u32 4294901760, %v205_v44  ;;  %v2929_v22 = vsub.f32 %v199_v33, %v265_v1  ;;  %v271_v27 = vand.u32 4294901760, %v208_v55  ;;  %v213_v52 = vld [vmem:[#allocation5 + $0x130] sm:$0xff] }
  0x6d   : > { %3971 = vst [vmem:[#allocation29_spill] sm:$0xff] %v2921_v59  ;;  %2269 = vmatprep.subr.bf16.mxu1 %v2921_v59  ;;  %v275_v9 = vand.u32 4294901760, %v212_v56  ;;  %v1126_v29 = vand.u32 4294901760, %v210_v57  ;;  %v2931_v31 = vpack.c.bf16 %v269_v3, %v265_v1  ;;  %v2933_v37 = vsub.f32 %v203_v38, %v269_v3 }
  0x6e   : > { %v2935_v11 = vpack.c.bf16 %v1124_v20, %v1120_v4  ;;  %v2937_v32 = vsub.f32 %v201_v43, %v1120_v4  ;;  %v2939_v59 = vsub.f32 %v205_v44, %v1124_v20  ;;  %v2943_v5 = vsub.f32 %v208_v55, %v271_v27  ;;  %v222_v55 = vld [vmem:[#allocation5 + $0x178] sm:$0xff] }
  0x6f   : > { %3972 = vst [vmem:[#allocation30_spill] sm:$0xff] %v2931_v31  ;;  %v2941_v33 = vpack.c.bf16 %v275_v9, %v271_v27  ;;  %v2945_v7 = vsub.f32 %v212_v56, %v275_v9  ;;  %2079 = vmatpush1.bf16.msra.mxu0 %v2931_v31  ;;  %v1130_v38 = vand.u32 4294901760, %v214_v21  ;;  %v2949_v1 = vsub.f32 %v210_v57, %v1126_v29  ;;  %v215_v57 = vld [vmem:[#allocation5 + $0x140] sm:$0xff] }
  0x70   : > { %3973 = vst [vmem:[#allocation31_spill] sm:$0xff] %v2935_v11  ;;  %3974 = vst [vmem:[#allocation32_spill] sm:$0xff] %v2937_v32  ;;  %2271 = vmatpush1.bf16.msra.mxu1 %v2935_v11  ;;  %v273_v43 = vand.u32 4294901760, %v207_v30  ;;  %v277_v3 = vand.u32 4294901760, %v211_v0  ;;  %v1128_v4 = vand.u32 4294901760, %v209_v10  ;;  %v1132_v44 = vand.u32 4294901760, %v213_v52 }
  0x71   : > { %3975 = vst [vmem:[#allocation33_spill] sm:$0xff] %v2939_v59  ;;  %3976 = vst [vmem:[#allocation34_spill] sm:$0xff] %v2941_v33  ;;  %2081 = vmatprep.subr.bf16.mxu0 %v2941_v33  ;;  %v279_v20 = vand.u32 4294901760, %v216_v34  ;;  %v283_v61 = vand.u32 4294901760, %v220_v13  ;;  %v2952_v27 = vpack.c.bf16 %v1130_v38, %v1126_v29  ;;  %v2954_v56 = vsub.f32 %v214_v21, %v1130_v38  ;;  %v219_v31 = vld [vmem:[#allocation5 + $0x160] sm:$0xff]  ;;  %v224_v29 = vld [vmem:[#allocation5 + $0x188] sm:$0xff] }
  0x72   : > { %3977 = vst [vmem:[#allocation35_spill] sm:$0xff] %v2943_v5  ;;  %3978 = vst [vmem:[#allocation36_spill] sm:$0xff] %v2945_v7  ;;  %v2956_v9 = vpack.c.bf16 %v277_v3, %v273_v43  ;;  %v2958_v11 = vsub.f32 %v207_v30, %v273_v43  ;;  %v2960_v46 = vsub.f32 %v211_v0, %v277_v3  ;;  %v1134_v0 = vand.u32 4294901760, %v218_v48 }
  0x73   : > { %3979 = vst [vmem:[#allocation37_spill] sm:$0xff] %v2949_v1  ;;  %3980 = vst [vmem:[#allocation38_spill] sm:$0xff] %v2952_v27  ;;  %v2962_v33 = vpack.c.bf16 %v1132_v44, %v1128_v4  ;;  %v2964_v25 = vsub.f32 %v209_v10, %v1128_v4  ;;  %v2966_v23 = vsub.f32 %v213_v52, %v1132_v44  ;;  %v228_v1 = vld [vmem:[#allocation5 + $0x1a8] sm:$0xff]  ;;  %2273 = vmatprep.subr.bf16.mxu1 %v2952_v27 }
  0x74   : > { %3981 = vst [vmem:[#allocation39_spill] sm:$0xff] %v2954_v56  ;;  %3982 = vst [vmem:[#allocation40_spill] sm:$0xff] %v2956_v9  ;;  %2083 = vmatpush1.bf16.msra.mxu0 %v2956_v9  ;;  %v2970_v21 = vpack.c.bf16 %v283_v61, %v279_v20  ;;  %v2972_v30 = vsub.f32 %v216_v34, %v279_v20  ;;  %v2974_v38 = vsub.f32 %v220_v13, %v283_v61  ;;  %v236_v56 = vld [vmem:[#allocation5 + $0x1e8] sm:$0xff] }
  0x75   : > { %3983 = vst [vmem:[#allocation41_spill] sm:$0xff] %v2958_v11  ;;  %3984 = vst [vmem:[#allocation42_spill] sm:$0xff] %v2960_v46  ;;  %2275 = vmatpush1.bf16.msra.mxu1 %v2962_v33  ;;  %v1138_v10 = vand.u32 4294901760, %v222_v55  ;;  %v281_v43 = vand.u32 4294901760, %v215_v57  ;;  %v285_v52 = vand.u32 4294901760, %v219_v31  ;;  %v1136_v3 = vand.u32 4294901760, %v217_v39 }
  0x76   : > { %3985 = vst [vmem:[#allocation43_spill] sm:$0xff] %v2962_v33  ;;  %3986 = vst [vmem:[#allocation44_spill] sm:$0xff] %v2964_v25  ;;  %2085 = vmatprep.subr.bf16.mxu0 %v2970_v21  ;;  %v2978_v4 = vsub.f32 %v218_v48, %v1134_v0  ;;  %v1140_v44 = vand.u32 4294901760, %v221_v16  ;;  %v287_v27 = vand.u32 4294901760, %v224_v29  ;;  %v291_v9 = vand.u32 4294901760, %v228_v1  ;;  %v230_v25 = vld [vmem:[#allocation5 + $0x1b8] sm:$0xff] }
  0x77   : > { %3987 = vst [vmem:[#allocation45_spill] sm:$0xff] %v2966_v23  ;;  %3988 = vst [vmem:[#allocation46_spill] sm:$0xff] %v2970_v21  ;;  %v226_v23 = vld [vmem:[#allocation5 + $0x198] sm:$0xff]  ;;  %v2980_v34 = vpack.c.bf16 %v1138_v10, %v1134_v0  ;;  %v2982_v61 = vsub.f32 %v222_v55, %v1138_v10  ;;  %v2984_v13 = vpack.c.bf16 %v285_v52, %v281_v43  ;;  %v223_v33 = vld [vmem:[#allocation5 + $0x180] sm:$0xff] }
  0x78   : > { %3989 = vst [vmem:[#allocation47_spill] sm:$0xff] %v2972_v30  ;;  %3990 = vst [vmem:[#allocation48_spill] sm:$0xff] %v2974_v38  ;;  %v2986_v20 = vsub.f32 %v215_v57, %v281_v43  ;;  %v227_v38 = vld [vmem:[#allocation5 + $0x1a0] sm:$0xff]  ;;  %v225_v30 = vld [vmem:[#allocation5 + $0x190] sm:$0xff]  ;;  %v2988_v46 = vsub.f32 %v219_v31, %v285_v52  ;;  %v2990_v48 = vpack.c.bf16 %v1140_v44, %v1136_v3  ;;  %v1142_v31 = vand.u32 4294901760, %v226_v23 }
  0x79   : > { %3991 = vst [vmem:[#allocation49_spill] sm:$0xff] %v2978_v4  ;;  %3992 = vst [vmem:[#allocation50_spill] sm:$0xff] %v2980_v34  ;;  %v2992_v21 = vsub.f32 %v217_v39, %v1136_v3  ;;  %v2994_v4 = vsub.f32 %v221_v16, %v1140_v44  ;;  %v229_v11 = vld [vmem:[#allocation5 + $0x1b0] sm:$0xff]  ;;  %v232_v0 = vld [vmem:[#allocation5 + $0x1c8] sm:$0xff]  ;;  %2277 = vmatprep.subr.bf16.mxu1 %v2980_v34  ;;  %2087 = vmatpush1.bf16.msra.mxu0 %v2984_v13  ;;  %v1146_v39 = vand.u32 4294901760, %v230_v25 }
  0x7a   : > { %3993 = vst [vmem:[#allocation51_spill] sm:$0xff] %v2982_v61  ;;  %3994 = vst [vmem:[#allocation52_spill] sm:$0xff] %v2984_v13  ;;  %v2998_v55 = vpack.c.bf16 %v291_v9, %v287_v27  ;;  %v3000_v57 = vsub.f32 %v224_v29, %v287_v27  ;;  %v3002_v10 = vsub.f32 %v228_v1, %v291_v9  ;;  %2279 = vmatpush1.bf16.msra.mxu1 %v2990_v48 }
  0x7b   : > { %3995 = vst [vmem:[#allocation53_spill] sm:$0xff] %v2986_v20  ;;  %3996 = vst [vmem:[#allocation54_spill] sm:$0xff] %v2988_v46  ;;  %v289_v43 = vand.u32 4294901760, %v223_v33  ;;  %v293_v16 = vand.u32 4294901760, %v227_v38  ;;  %v1144_v52 = vand.u32 4294901760, %v225_v30  ;;  %v3006_v3 = vsub.f32 %v226_v23, %v1142_v31  ;;  %v237_v20 = vld [vmem:[#allocation5 + $0x1f0] sm:$0xff] }
  0x7c   : > { %3997 = vst [vmem:[#allocation55_spill] sm:$0xff] %v2990_v48  ;;  %3998 = vst [vmem:[#allocation56_spill] sm:$0xff] %v2992_v21  ;;  %2089 = vmatprep.subr.bf16.mxu0 %v2998_v55  ;;  %v1148_v44 = vand.u32 4294901760, %v229_v11  ;;  %v295_v34 = vand.u32 4294901760, %v232_v0  ;;  %v299_v13 = vand.u32 4294901760, %v236_v56  ;;  %v238_v21 = vld [vmem:[#allocation5 + $0x1f8] sm:$0xff]  ;;  %v3008_v27 = vpack.c.bf16 %v1146_v39, %v1142_v31 }
  0x7d   : > { %3999 = vst [vmem:[#allocation57_spill] sm:$0xff] %v2994_v4  ;;  %4000 = vst [vmem:[#allocation58_spill] sm:$0xff] %v2998_v55  ;;  %v234_v4 = vld [vmem:[#allocation5 + $0x1d8] sm:$0xff]  ;;  %v3010_v1 = vsub.f32 %v230_v25, %v1146_v39  ;;  %v3012_v9 = vpack.c.bf16 %v293_v16, %v289_v43  ;;  %v3014_v29 = vsub.f32 %v223_v33, %v289_v43  ;;  %v231_v48 = vld [vmem:[#allocation5 + $0x1c0] sm:$0xff]  ;;  %v1154_v39 = vand.u32 4294901760, %v238_v21 }
  0x7e   : > { %4001 = vst [vmem:[#allocation59_spill] sm:$0xff] %v3000_v57  ;;  %4002 = vst [vmem:[#allocation60_spill] sm:$0xff] %v3002_v10  ;;  %v235_v10 = vld [vmem:[#allocation5 + $0x1e0] sm:$0xff]  ;;  %v233_v57 = vld [vmem:[#allocation5 + $0x1d0] sm:$0xff]  ;;  %v3016_v46 = vsub.f32 %v227_v38, %v293_v16  ;;  %v3018_v23 = vpack.c.bf16 %v1148_v44, %v1144_v52  ;;  %v3020_v55 = vsub.f32 %v225_v30, %v1144_v52  ;;  %2281 = vmatprep.subr.bf16.mxu1 %v3008_v27 }
  0x7f   : > { %4003 = vst [vmem:[#allocation61_spill] sm:$0xff] %v3006_v3  ;;  %4004 = vst [vmem:[#allocation62_spill] sm:$0xff] %v3008_v27  ;;  %v3022_v3 = vsub.f32 %v229_v11, %v1148_v44  ;;  %2091 = vmatpush1.bf16.msra.mxu0 %v3012_v9  ;;  %v3026_v25 = vpack.c.bf16 %v299_v13, %v295_v34  ;;  %v3028_v33 = vsub.f32 %v232_v0, %v295_v34 }
  0x80   : > { %4005 = vst [vmem:[#allocation63_spill] sm:$0xff] %v3012_v9  ;;  %4006 = vst [vmem:[#allocation64_spill] sm:$0xff] %v3018_v23  ;;  %v3030_v31 = vsub.f32 %v236_v56, %v299_v13  ;;  %v1150_v38 = vand.u32 4294901760, %v234_v4  ;;  %2283 = vmatpush1.bf16.msra.mxu1 %v3018_v23  ;;  %v297_v30 = vand.u32 4294901760, %v231_v48  ;;  %v301_v43 = vand.u32 4294901760, %v235_v10  ;;  %v174_v9 = vld [vmem:[%s2819_s29] sm:$0xff] }
  0x81   : > { %4007 = vst [vmem:[#allocation65_spill] sm:$0xff] %v3026_v25  ;;  %v1152_v11 = vand.u32 4294901760, %v233_v57  ;;  %2093 = vmatprep.subr.bf16.mxu0 %v3026_v25  ;;  %v1156_v52 = vand.u32 4294901760, %v237_v20  ;;  %v3824_v44 = vand.u32 4294901760, %v2833_v17  ;;  %v3823_v34 = vand.u32 4294901760, %v2835_v18 }
  0x82   : > { %4008 = vst [vmem:[#allocation66_spill] sm:$0xff] %v3030_v31  ;;  %v3034_v16 = vsub.f32 %v234_v4, %v1150_v38  ;;  %v3038_v0 = vpack.c.bf16 %v1154_v39, %v1150_v38  ;;  %v3040_v56 = vsub.f32 %v238_v21, %v1154_v39  ;;  %v3042_v13 = vpack.c.bf16 %v301_v43, %v297_v30 }
  0x83   : > { %v3044_v23 = vsub.f32 %v231_v48, %v297_v30  ;;  %v3047_v27 = vsub.f32 %v235_v10, %v301_v43  ;;  %v3049_v31 = vpack.c.bf16 %v1156_v52, %v1152_v11  ;;  %v3051_v4 = vsub.f32 %v233_v57, %v1152_v11 }
  0x84   : > { %4009 = vst [vmem:[#allocation67_spill] sm:$0xff] %v3034_v16  ;;  %4010 = vst [vmem:[#allocation68_spill] sm:$0xff] %v3038_v0  ;;  %v3053_v25 = vsub.f32 %v237_v20, %v1156_v52  ;;  %2285 = vmatprep.subr.bf16.mxu1 %v3038_v0  ;;  %2095 = vmatpush1.bf16.msra.mxu0 %v3042_v13  ;;  %v350_v21 = vsub.f32 %v2833_v17, %v3824_v44  ;;  %v3827_v10 = vand.u32 4294901760, %v2837_v19 }
  0x85   : > { %4011 = vst [vmem:[#allocation69_spill] sm:$0xff] %v3040_v56  ;;  %4012 = vst [vmem:[#allocation70_spill] sm:$0xff] %v3042_v13  ;;  %v362_v48 = vsub.f32 %v2835_v18, %v3823_v34  ;;  %v3832_v38 = vand.u32 4294901760, %v2841_v24  ;;  %2287 = vmatpush1.bf16.msra.mxu1 %v3049_v31  ;;  %v3066_v20 = vand.u32 4294901760, %v174_v9  ;;  %v3839_v57 = vand.u32 4294901760, %v2845_v26 }
  0x86   : > { %4013 = vst [vmem:[#allocation71_spill] sm:$0xff] %v3044_v23  ;;  %4014 = vst [vmem:[#allocation72_spill] sm:$0xff] %v3047_v27  ;;  %v3840_v39 = vand.u32 4294901760, %v2848_v28  ;;  %v3846_v30 = vand.u32 4294901760, %v2854_v40  ;;  %v351_v43 = vand.u32 4294901760, %v350_v21  ;;  %v1205_v52 = vsub.f32 %v2837_v19, %v3827_v10 }
  0x87   : > { %4015 = vst [vmem:[#allocation73_spill] sm:$0xff] %v3049_v31  ;;  %4016 = vst [vmem:[#allocation74_spill] sm:$0xff] %v3051_v4  ;;  %v363_v11 = vand.u32 4294901760, %v362_v48  ;;  %v1217_v34 = vsub.f32 %v2841_v24, %v3832_v38  ;;  %v3078_v44 = vsub.f32 %v174_v9, %v3066_v20  ;;  %v356_v31 = vsub.f32 %v2845_v26, %v3839_v57 }
  0x88   : > { %4017 = vst [vmem:[#allocation75_spill] sm:$0xff] %v3053_v25  ;;  %4018 = vst [vmem:[#allocation76_spill] sm:$0xff] %v3066_v20  ;;  %v368_v21 = vsub.f32 %v2848_v28, %v3840_v39  ;;  %v1211_v48 = vsub.f32 %v2854_v40, %v3846_v30  ;;  %v1206_v13 = vand.u32 4294901760, %v1205_v52  ;;  %v3843_v38 = vand.u32 4294901760, %v2856_v41 }
  0x89   : > { %4019 = vst [vmem:[#allocation77_spill] sm:$0xff] %v3078_v44  ;;  %v2096_v10 = vpack.c.bf16 %v363_v11, %v351_v43  ;;  %v1218_v0 = vand.u32 4294901760, %v1217_v34  ;;  %v3091_v9 = vand.u32 4294901760, %v3078_v44  ;;  %v357_v20 = vand.u32 4294901760, %v356_v31 }
  0x8a   : > { %v369_v24 = vand.u32 4294901760, %v368_v21  ;;  %v1212_v19 = vand.u32 4294901760, %v1211_v48  ;;  %v1223_v39 = vsub.f32 %v2856_v41, %v3843_v38  ;;  %v3844_v28 = vand.u32 4294901760, %v2858_v42 }
  0x8b   : > { %4020 = vst [vmem:[#allocation78_spill] sm:$0xff] %v3091_v9  ;;  %2097 = vmatprep.subr.bf16.mxu0 %v2096_v10  ;;  %v2288_v57 = vpack.c.bf16 %v1218_v0, %v1206_v13  ;;  %v3845_v43 = vand.u32 4294901760, %v2862_v47  ;;  %v339_v34 = vsub.f32 %v3078_v44, %v3091_v9  ;;  %v3847_v52 = vand.u32 4294901760, %v2866_v49 }
  0x8c   : > { %v2098_v11 = vpack.c.bf16 %v369_v24, %v357_v20  ;;  %v3850_v31 = vand.u32 4294901760, %v2869_v51  ;;  %v1224_v21 = vand.u32 4294901760, %v1223_v39  ;;  %v374_v0 = vsub.f32 %v2858_v42, %v3844_v28 }
  0x8d   : > { %2289 = vmatprep.subr.bf16.mxu1 %v2288_v57  ;;  %v386_v13 = vsub.f32 %v2862_v47, %v3845_v43  ;;  %v3851_v10 = vand.u32 4294901760, %v2871_v53  ;;  %v340_v48 = vand.u32 4294901760, %v339_v34  ;;  %v1229_v24 = vsub.f32 %v2866_v49, %v3847_v52 }
  0x8e   : > { %v1241_v20 = vsub.f32 %v2869_v51, %v3850_v31  ;;  %v3856_v57 = vand.u32 4294901760, %v2877_v62  ;;  %v2290_v39 = vpack.c.bf16 %v1224_v21, %v1212_v19  ;;  %v375_v38 = vand.u32 4294901760, %v374_v0 }
  0x8f   : > { %v387_v28 = vand.u32 4294901760, %v386_v13  ;;  %v380_v43 = vsub.f32 %v2871_v53, %v3851_v10  ;;  %341 = vmatmul.mubr.f32.vlgmr.msra.gmra.mrb[0].mxu0 %v340_v48  ;;  %1196 = vmatmul.mubr.f32.vlgmr.msra.gmra.mrb[0].mxu1 %v340_v48  ;;  %v1230_v34 = vand.u32 4294901760, %v1229_v24  ;;  %v3852_v9 = vand.u32 4294901760, %v2879_v63 }
  0x90   : > { %v1242_v30 = vand.u32 4294901760, %v1241_v20  ;;  %v392_v52 = vsub.f32 %v2877_v62, %v3856_v57  ;;  %2099 = vmatpush1.bf16.msra.mxu0 %v2098_v11  ;;  %2291 = vmatpush1.bf16.msra.mxu1 %v2290_v39  ;;  %v3853_v21 = vand.u32 4294901760, %v2883_v6  ;;  %v3854_v0 = vand.u32 4294901760, %v2887_v8 }
  0x91   : > { %v2100_v31 = vpack.c.bf16 %v387_v28, %v375_v38  ;;  %v381_v19 = vand.u32 4294901760, %v380_v43  ;;  %v1235_v48 = vsub.f32 %v2879_v63, %v3852_v9  ;;  %v3855_v24 = vand.u32 4294901760, %v2890_v12 }
  0x92   : > { %v2292_v13 = vpack.c.bf16 %v1242_v30, %v1230_v34  ;;  %v393_v10 = vand.u32 4294901760, %v392_v52  ;;  %v4021_v20 = vmov 0.0   ;;  %v1247_v28 = vsub.f32 %v2883_v6, %v3853_v21 }
  0x93   : > { %571 = vmatprep.mubr.f32.mxu0 %v4021_v20  ;;  %1426 = vmatprep.mubr.f32.mxu1 %v4021_v20  ;;  %v398_v38 = vsub.f32 %v2887_v8, %v3854_v0  ;;  %v3857_v30 = vand.u32 4294901760, %v2894_v14  ;;  %v3868_v43 = vand.u32 4294901760, %v2896_v15  ;;  %v1236_v52 = vand.u32 4294901760, %v1235_v48 }
  0x94   : > { %2101 = vmatprep.subr.bf16.mxu0 %v2100_v31  ;;  %2293 = vmatprep.subr.bf16.mxu1 %v2292_v13  ;;  %v2102_v11 = vpack.c.bf16 %v393_v10, %v381_v19  ;;  %v410_v39 = vsub.f32 %v2890_v12, %v3855_v24  ;;  %v3860_v31 = vand.u32 4294901760, %v2903_v35  ;;  %v1248_v34 = vand.u32 4294901760, %v1247_v28 }
  0x95   : > { %v399_v9 = vand.u32 4294901760, %v398_v38  ;;  %v1253_v21 = vsub.f32 %v2894_v14, %v3857_v30  ;;  %v1265_v0 = vsub.f32 %v2896_v15, %v3868_v43  ;;  %v3861_v19 = vand.u32 4294901760, %v2905_v36 }
  0x96   : > { %2103 = vmatpush1.bf16.msra.mxu0 %v2102_v11  ;;  %v411_v13 = vand.u32 4294901760, %v410_v39  ;;  %v404_v10 = vsub.f32 %v2903_v35, %v3860_v31  ;;  %v3865_v48 = vand.u32 4294901760, %v2909_v45  ;;  %v2294_v28 = vpack.c.bf16 %v1248_v34, %v1236_v52 }
  0x97   : > { %v1254_v38 = vand.u32 4294901760, %v1253_v21  ;;  %v1266_v24 = vand.u32 4294901760, %v1265_v0  ;;  %v3862_v57 = vand.u32 4294901760, %v2911_v50  ;;  %v416_v11 = vsub.f32 %v2905_v36, %v3861_v19 }
  0x98   : > { %v2104_v30 = vpack.c.bf16 %v411_v13, %v399_v9  ;;  %v405_v44 = vand.u32 4294901760, %v404_v10  ;;  %v1259_v39 = vsub.f32 %v2909_v45, %v3865_v48  ;;  %2295 = vmatpush1.bf16.msra.mxu1 %v2294_v28  ;;  %v3863_v21 = vand.u32 4294901760, %v2915_v54 }
  0x99   : > { %v2296_v31 = vpack.c.bf16 %v1266_v24, %v1254_v38  ;;  %v1271_v52 = vsub.f32 %v2911_v50, %v3862_v57  ;;  %v3864_v0 = vand.u32 4294901760, %v2919_v58  ;;  %v417_v9 = vand.u32 4294901760, %v416_v11 }
  0x9a   : > { %2105 = vmatprep.subr.bf16.mxu0 %v2104_v30  ;;  %v1260_v34 = vand.u32 4294901760, %v1259_v39  ;;  %v3866_v13 = vand.u32 4294901760, %v2923_v60  ;;  %v3867_v10 = vand.u32 4294901760, %v2926_v2  ;;  %v422_v24 = vsub.f32 %v2915_v54, %v3863_v21 }
  0x9b   : > { %2297 = vmatprep.subr.bf16.mxu1 %v2296_v31  ;;  %v1272_v19 = vand.u32 4294901760, %v1271_v52  ;;  %v434_v28 = vsub.f32 %v2919_v58, %v3864_v0  ;;  %v3871_v38 = vand.u32 4294901760, %v2929_v22  ;;  %v2106_v57 = vpack.c.bf16 %v417_v9, %v405_v44 }
  0x9c   : > { %v1277_v30 = vsub.f32 %v2923_v60, %v3866_v13  ;;  %v1289_v31 = vsub.f32 %v2926_v2, %v3867_v10  ;;  %v3870_v11 = vand.u32 4294901760, %v2933_v37  ;;  %v423_v52 = vand.u32 4294901760, %v422_v24 }
  0x9d   : > { %v2298_v39 = vpack.c.bf16 %v1272_v19, %v1260_v34  ;;  %v435_v21 = vand.u32 4294901760, %v434_v28  ;;  %v428_v0 = vsub.f32 %v2929_v22, %v3871_v38  ;;  %2107 = vmatpush1.bf16.msra.mxu0 %v2106_v57  ;;  %v3869_v13 = vand.u32 4294901760, %v2937_v32 }
  0x9e   : > { %v1278_v48 = vand.u32 4294901760, %v1277_v30  ;;  %v1290_v44 = vand.u32 4294901760, %v1289_v31  ;;  %v440_v9 = vsub.f32 %v2933_v37, %v3870_v11  ;;  %v3874_v19 = vand.u32 4294901760, %v2939_v59 }
  0x9f   : > { %2299 = vmatpush1.bf16.msra.mxu1 %v2298_v39  ;;  %v2108_v10 = vpack.c.bf16 %v435_v21, %v423_v52  ;;  %v429_v43 = vand.u32 4294901760, %v428_v0  ;;  %v3875_v34 = vand.u32 4294901760, %v2943_v5  ;;  %v1283_v57 = vsub.f32 %v2937_v32, %v3869_v13  ;;  %v4022_v0 = vld [vmem:[#allocation37_spill] sm:$0xff]  ;;  %v4023_v52 = vld [vmem:[#allocation39_spill] sm:$0xff] }
  0xa0   : > { %v2300_v24 = vpack.c.bf16 %v1290_v44, %v1278_v48  ;;  %v441_v28 = vand.u32 4294901760, %v440_v9  ;;  %v3876_v30 = vand.u32 4294901760, %v2945_v7  ;;  %v1295_v31 = vsub.f32 %v2939_v59, %v3874_v19 }
  0xa1   : > { %2109 = vmatprep.subr.bf16.mxu0 %v2108_v10  ;;  %v446_v21 = vsub.f32 %v2943_v5, %v3875_v34  ;;  %v3884_v39 = vand.u32 4294901760, %v4022_v0  ;;  %v3887_v48 = vand.u32 4294901760, %v4023_v52  ;;  %v1284_v9 = vand.u32 4294901760, %v1283_v57  ;;  %v4024_v10 = vld [vmem:[#allocation41_spill] sm:$0xff] }
  0xa2   : > { %2301 = vmatprep.subr.bf16.mxu1 %v2300_v24  ;;  %v2110_v44 = vpack.c.bf16 %v441_v28, %v429_v43  ;;  %v458_v13 = vsub.f32 %v2945_v7, %v3876_v30  ;;  %v3886_v11 = vand.u32 4294901760, %v4024_v10  ;;  %v1296_v38 = vand.u32 4294901760, %v1295_v31  ;;  %v4025_v28 = vld [vmem:[#allocation42_spill] sm:$0xff]  ;;  %v4026_v30 = vld [vmem:[#allocation44_spill] sm:$0xff]  ;;  %v4027_v7 = vld [vmem:[#allocation45_spill] sm:$0xff] }
  0xa3   : > { %v447_v32 = vand.u32 4294901760, %v446_v21  ;;  %v1301_v19 = vsub.f32 %v4022_v0, %v3884_v39  ;;  %v1313_v34 = vsub.f32 %v4023_v52, %v3887_v48  ;;  %v3889_v57 = vand.u32 4294901760, %v4025_v28 }
  0xa4   : > { %2111 = vmatpush1.bf16.msra.mxu0 %v2110_v44  ;;  %v459_v24 = vand.u32 4294901760, %v458_v13  ;;  %v452_v43 = vsub.f32 %v4024_v10, %v3886_v11  ;;  %v3892_v59 = vand.u32 4294901760, %v4026_v30  ;;  %v2302_v31 = vpack.c.bf16 %v1296_v38, %v1284_v9  ;;  %v4029_v9 = vld [vmem:[#allocation48_spill] sm:$0xff] }
  0xa5   : > { %v1302_v21 = vand.u32 4294901760, %v1301_v19  ;;  %v1314_v20 = vand.u32 4294901760, %v1313_v34  ;;  %v3891_v5 = vand.u32 4294901760, %v4027_v7  ;;  %v464_v44 = vsub.f32 %v4025_v28, %v3889_v57  ;;  %v4028_v19 = vld [vmem:[#allocation47_spill] sm:$0xff] }
  0xa6   : > { %v2112_v39 = vpack.c.bf16 %v459_v24, %v447_v32  ;;  %v453_v0 = vand.u32 4294901760, %v452_v43  ;;  %v1307_v13 = vsub.f32 %v4026_v30, %v3892_v59  ;;  %2303 = vmatpush1.bf16.msra.mxu1 %v2302_v31  ;;  %v3894_v34 = vand.u32 4294901760, %v4028_v19  ;;  %v4030_v43 = vld [vmem:[#allocation49_spill] sm:$0xff] }
  0xa7   : > { %v2304_v11 = vpack.c.bf16 %v1314_v20, %v1302_v21  ;;  %v1319_v38 = vsub.f32 %v4027_v7, %v3891_v5  ;;  %v3895_v48 = vand.u32 4294901760, %v4029_v9  ;;  %v465_v32 = vand.u32 4294901760, %v464_v44  ;;  %v4031_v21 = vld [vmem:[#allocation53_spill] sm:$0xff]  ;;  %v4032_v44 = vld [vmem:[#allocation54_spill] sm:$0xff] }
  0xa8   : > { %2113 = vmatprep.subr.bf16.mxu0 %v2112_v39  ;;  %v1308_v24 = vand.u32 4294901760, %v1307_v13  ;;  %v3897_v10 = vand.u32 4294901760, %v4030_v43  ;;  %v3899_v57 = vand.u32 4294901760, %v2982_v61  ;;  %v470_v20 = vsub.f32 %v4028_v19, %v3894_v34  ;;  %v4034_v19 = vld [vmem:[#allocation57_spill] sm:$0xff] }
  0xa9   : > { %2305 = vmatprep.subr.bf16.mxu1 %v2304_v11  ;;  %v1320_v28 = vand.u32 4294901760, %v1319_v38  ;;  %v482_v31 = vsub.f32 %v4029_v9, %v3895_v48  ;;  %v3906_v5 = vand.u32 4294901760, %v4031_v21  ;;  %v2114_v59 = vpack.c.bf16 %v465_v32, %v453_v0 }
  0xaa   : > { %v1325_v39 = vsub.f32 %v4030_v43, %v3897_v10  ;;  %v1337_v11 = vsub.f32 %v2982_v61, %v3899_v57  ;;  %v3904_v13 = vand.u32 4294901760, %v4032_v44  ;;  %v471_v7 = vand.u32 4294901760, %v470_v20  ;;  %v4033_v10 = vld [vmem:[#allocation56_spill] sm:$0xff] }
  0xab   : > { %v2306_v38 = vpack.c.bf16 %v1320_v28, %v1308_v24  ;;  %v483_v34 = vand.u32 4294901760, %v482_v31  ;;  %v476_v48 = vsub.f32 %v4031_v21, %v3906_v5  ;;  %2115 = vmatpush1.bf16.msra.mxu0 %v2114_v59  ;;  %v3905_v43 = vand.u32 4294901760, %v4033_v10  ;;  %v4035_v24 = vld [vmem:[#allocation59_spill] sm:$0xff] }
  0xac   : > { %v1326_v9 = vand.u32 4294901760, %v1325_v39  ;;  %v1338_v0 = vand.u32 4294901760, %v1337_v11  ;;  %v488_v32 = vsub.f32 %v4032_v44, %v3904_v13  ;;  %v3907_v28 = vand.u32 4294901760, %v4034_v19  ;;  %v4036_v39 = vld [vmem:[#allocation60_spill] sm:$0xff] }
  0xad   : > { %2307 = vmatpush1.bf16.msra.mxu1 %v2306_v38  ;;  %v2116_v57 = vpack.c.bf16 %v483_v34, %v471_v7  ;;  %v477_v61 = vand.u32 4294901760, %v476_v48  ;;  %v3908_v20 = vand.u32 4294901760, %v4035_v24  ;;  %v1331_v59 = vsub.f32 %v4033_v10, %v3905_v43  ;;  %v4037_v48 = vld [vmem:[#allocation61_spill] sm:$0xff] }
  0xae   : > { %v2308_v31 = vpack.c.bf16 %v1338_v0, %v1326_v9  ;;  %v489_v30 = vand.u32 4294901760, %v488_v32  ;;  %v3909_v11 = vand.u32 4294901760, %v4036_v39  ;;  %v1343_v13 = vsub.f32 %v4034_v19, %v3907_v28 }
  0xaf   : > { %2117 = vmatprep.subr.bf16.mxu0 %v2116_v57  ;;  %v494_v7 = vsub.f32 %v4035_v24, %v3908_v20  ;;  %v3911_v34 = vand.u32 4294901760, %v4037_v48  ;;  %v3915_v9 = vand.u32 4294901760, %v3010_v1  ;;  %v1332_v0 = vand.u32 4294901760, %v1331_v59 }
  0xb0   : > { %2309 = vmatprep.subr.bf16.mxu1 %v2308_v31  ;;  %v2118_v38 = vpack.c.bf16 %v489_v30, %v477_v61  ;;  %v506_v32 = vsub.f32 %v4036_v39, %v3909_v11  ;;  %v3913_v57 = vand.u32 4294901760, %v3014_v29  ;;  %v1344_v43 = vand.u32 4294901760, %v1343_v13 }
  0xb1   : > { %v495_v5 = vand.u32 4294901760, %v494_v7  ;;  %v1349_v28 = vsub.f32 %v4037_v48, %v3911_v34  ;;  %v1361_v20 = vsub.f32 %v3010_v1, %v3915_v9  ;;  %v3914_v30 = vand.u32 4294901760, %v3016_v46 }
  0xb2   : > { %2119 = vmatpush1.bf16.msra.mxu0 %v2118_v38  ;;  %v507_v31 = vand.u32 4294901760, %v506_v32  ;;  %v500_v61 = vsub.f32 %v3014_v29, %v3913_v57  ;;  %v3919_v59 = vand.u32 4294901760, %v3020_v55  ;;  %v2310_v13 = vpack.c.bf16 %v1344_v43, %v1332_v0 }
  0xb3   : > { %v1350_v7 = vand.u32 4294901760, %v1349_v28  ;;  %v1362_v11 = vand.u32 4294901760, %v1361_v20  ;;  %v3916_v39 = vand.u32 4294901760, %v3022_v3  ;;  %v512_v38 = vsub.f32 %v3016_v46, %v3914_v30  ;;  %v4038_v20 = vld [vmem:[#allocation66_spill] sm:$0xff] }
  0xb4   : > { %v2120_v34 = vpack.c.bf16 %v507_v31, %v495_v5  ;;  %v501_v48 = vand.u32 4294901760, %v500_v61  ;;  %v1355_v32 = vsub.f32 %v3020_v55, %v3919_v59  ;;  %2311 = vmatpush1.bf16.msra.mxu1 %v2310_v13  ;;  %v3917_v28 = vand.u32 4294901760, %v3028_v33 }
  0xb5   : > { %v2312_v57 = vpack.c.bf16 %v1362_v11, %v1350_v7  ;;  %v1367_v43 = vsub.f32 %v3022_v3, %v3916_v39  ;;  %v3918_v0 = vand.u32 4294901760, %v4038_v20  ;;  %v513_v5 = vand.u32 4294901760, %v512_v38 }
  0xb6   : > { %2121 = vmatprep.subr.bf16.mxu0 %v2120_v34  ;;  %v1356_v31 = vand.u32 4294901760, %v1355_v32  ;;  %v3920_v61 = vand.u32 4294901760, %v3034_v16  ;;  %v3921_v30 = vand.u32 4294901760, %v3040_v56  ;;  %v518_v11 = vsub.f32 %v3028_v33, %v3917_v28 }
  0xb7   : > { %2313 = vmatprep.subr.bf16.mxu1 %v2312_v57  ;;  %v1368_v9 = vand.u32 4294901760, %v1367_v43  ;;  %v530_v13 = vsub.f32 %v4038_v20, %v3918_v0  ;;  %v3927_v7 = vand.u32 4294901760, %v3044_v23  ;;  %v2122_v39 = vpack.c.bf16 %v513_v5, %v501_v48 }
  0xb8   : > { %v1373_v34 = vsub.f32 %v3034_v16, %v3920_v61  ;;  %v1385_v57 = vsub.f32 %v3040_v56, %v3921_v30  ;;  %v3926_v38 = vand.u32 4294901760, %v3047_v27  ;;  %v519_v43 = vand.u32 4294901760, %v518_v11 }
  0xb9   : > { %v2314_v32 = vpack.c.bf16 %v1368_v9, %v1356_v31  ;;  %v531_v28 = vand.u32 4294901760, %v530_v13  ;;  %v524_v0 = vsub.f32 %v3044_v23, %v3927_v7  ;;  %2123 = vmatpush1.bf16.msra.mxu0 %v2122_v39  ;;  %v3924_v61 = vand.u32 4294901760, %v3051_v4 }
  0xba   : > { %v1374_v59 = vand.u32 4294901760, %v1373_v34  ;;  %v1386_v48 = vand.u32 4294901760, %v1385_v57  ;;  %v536_v5 = vsub.f32 %v3047_v27, %v3926_v38  ;;  %v3925_v9 = vand.u32 4294901760, %v3053_v25  ;;  %v4044_v38 = vld [vmem:[#allocation36_spill] sm:$0xff] }
  0xbb   : > { %2315 = vmatpush1.bf16.msra.mxu1 %v2314_v32  ;;  %v2124_v30 = vpack.c.bf16 %v531_v28, %v519_v43  ;;  %v525_v56 = vand.u32 4294901760, %v524_v0  ;;  %v1379_v13 = vsub.f32 %v3051_v4, %v3924_v61  ;;  %v2128_v34 = vpack.c.bf16 %v2835_v18, %v2833_v17  ;;  %v4039_v32 = vld [vmem:[#allocation14_spill] sm:$0xff] }
  0xbc   : > { %v2316_v31 = vpack.c.bf16 %v1386_v48, %v1374_v59  ;;  %v537_v11 = vand.u32 4294901760, %v536_v5  ;;  %v1391_v39 = vsub.f32 %v3053_v25, %v3925_v9  ;;  %v4040_v59 = vld [vmem:[#allocation16_spill] sm:$0xff]  ;;  %v4041_v48 = vld [vmem:[#allocation18_spill] sm:$0xff]  ;;  %v4045_v7 = vmov 0.0  }
  0xbd   : > { %2125 = vmatprep.subr.bf16.mxu0 %v2124_v30  ;;  %v1380_v28 = vand.u32 4294901760, %v1379_v13  ;;  %v2320_v43 = vpack.c.bf16 %v4040_v59, %v4039_v32  ;;  %v2130_v5 = vpack.c.bf16 %v4041_v48, %v2845_v26  ;;  %v2132_v30 = vpack.c.bf16 %v2862_v47, %v2858_v42  ;;  %v4042_v9 = vld [vmem:[#allocation76_spill] sm:$0xff] }
  0xbe   : > { %2317 = vmatprep.subr.bf16.mxu1 %v2316_v31  ;;  %v2126_v57 = vpack.c.bf16 %v537_v11, %v525_v56  ;;  %v1392_v0 = vand.u32 4294901760, %v1391_v39  ;;  %v2322_v56 = vpack.c.bf16 %v2856_v41, %v2854_v40  ;;  %v2324_v31 = vpack.c.bf16 %v2869_v51, %v2866_v49 }
  0xbf   : > { %v2134_v11 = vpack.c.bf16 %v2877_v62, %v2871_v53  ;;  %v2326_v13 = vpack.c.bf16 %v2883_v6, %v2879_v63  ;;  %v2136_v39 = vpack.c.bf16 %v2890_v12, %v2887_v8  ;;  %v4046_v18 = vand.u32 4294901760, %v4039_v32 }
  0xc0   : > { %2127 = vmatpush1.bf16.msra.mxu0 %v2126_v57  ;;  %v2318_v61 = vpack.c.bf16 %v1392_v0, %v1380_v28  ;;  %v2330_v57 = vpack.c.bf16 %v2911_v50, %v2909_v45  ;;  %v2140_v28 = vpack.c.bf16 %v2919_v58, %v2915_v54  ;;  %v2332_v0 = vpack.c.bf16 %v2926_v2, %v2923_v60 }
  0xc1   : > { %2129 = vmatprep.subr.bf16.mxu0 %v2128_v34  ;;  %v2138_v34 = vpack.c.bf16 %v2905_v36, %v2903_v35  ;;  %v4047_v17 = vand.u32 4294901760, %v4040_v59  ;;  %v4048_v4 = vand.u32 4294901760, %v2845_v26  ;;  %v4050_v23 = vand.u32 4294901760, %v2854_v40 }
  0xc2   : > { %2319 = vmatpush1.bf16.msra.mxu1 %v2318_v61  ;;  %v2328_v61 = vpack.c.bf16 %v2896_v15, %v2894_v14  ;;  %v4051_v16 = vand.u32 4294901760, %v2856_v41  ;;  %v4052_v32 = vand.u32 4294901760, %v2858_v42  ;;  %v4054_v26 = vand.u32 4294901760, %v2866_v49 }
  0xc3   : > { %573 = vmatmul.mubr.f32.vlgmr.msra.gmra.mrb[0].mxu0 %v4042_v9  ;;  %2321 = vmatprep.subr.bf16.mxu1 %v2320_v43  ;;  %v2142_v43 = vpack.c.bf16 %v2933_v37, %v2929_v22  ;;  %v3363_v25 = vpack.c.bf16 %v4047_v17, %v4046_v18  ;;  %v4053_v17 = vand.u32 4294901760, %v2862_v47  ;;  %v4055_v59 = vand.u32 4294901760, %v2869_v51 }
  0xc4   : > { %2131 = vmatpush1.bf16.msra.mxu0 %v2130_v5  ;;  %v4043_v5 = vld [vmem:[#allocation35_spill] sm:$0xff]  ;;  %707 = vmatprep.mubr.f32.mxu0 %v4045_v7  ;;  %v3376_v20 = vpack.c.bf16 %v4051_v16, %v4050_v23  ;;  %v4056_v40 = vand.u32 4294901760, %v2871_v53  ;;  %v4057_v41 = vand.u32 4294901760, %v2877_v62  ;;  %v4058_v42 = vand.u32 4294901760, %v2879_v63 }
  0xc5   : > { %2133 = vmatprep.subr.bf16.mxu0 %v2132_v30  ;;  %1428 = vmatmul.mubr.f32.vlgmr.msra.gmra.mrb[0].mxu1 %v4042_v9  ;;  %v2144_v30 = vpack.c.bf16 %v4044_v38, %v4043_v5  ;;  %v4049_v9 = vand.u32 4294901760, %v4041_v48  ;;  %v3382_v18 = vpack.c.bf16 %v4053_v17, %v4052_v32  ;;  %v4059_v47 = vand.u32 4294901760, %v2883_v6 }
  0xc6   : > { %2323 = vmatpush1.bf16.msra.mxu1 %v2322_v56  ;;  %1562 = vmatprep.mubr.f32.mxu1 %v4045_v7  ;;  %v3394_v23 = vpack.c.bf16 %v4057_v41, %v4056_v40  ;;  %v4061_v49 = vand.u32 4294901760, %v2890_v12  ;;  %v4062_v48 = vand.u32 4294901760, %v2894_v14  ;;  %v4063_v53 = vand.u32 4294901760, %v2896_v15  ;;  %v4080_v41 = vld [vmem:[#allocation37_spill] sm:$0xff] }
  0xc7   : > { %v3370_v27 = vpack.c.bf16 %v4049_v9, %v4048_v4  ;;  %2325 = vmatprep.subr.bf16.mxu1 %v2324_v31  ;;  %v3388_v4 = vpack.c.bf16 %v4055_v59, %v4054_v26  ;;  %v3400_v16 = vpack.c.bf16 %v4059_v47, %v4058_v42  ;;  %v4060_v9 = vand.u32 4294901760, %v2887_v8  ;;  %v4076_v59 = vld [vmem:[#allocation33_spill] sm:$0xff] }
  0xc8   : > { %2135 = vmatpush1.bf16.msra.mxu0 %v2134_v11  ;;  %v3412_v62 = vpack.c.bf16 %v4063_v53, %v4062_v48  ;;  %v4064_v56 = vand.u32 4294901760, %v2903_v35  ;;  %v4065_v63 = vand.u32 4294901760, %v2905_v36  ;;  %v4066_v31 = vand.u32 4294901760, %v2909_v45  ;;  %v4083_v47 = vld [vmem:[#allocation41_spill] sm:$0xff] }
  0xc9   : > { %2137 = vmatprep.subr.bf16.mxu0 %v2136_v39  ;;  %v3406_v51 = vpack.c.bf16 %v4061_v49, %v4060_v9  ;;  %v4067_v8 = vand.u32 4294901760, %v2911_v50  ;;  %v4068_v12 = vand.u32 4294901760, %v2915_v54  ;;  %v4069_v14 = vand.u32 4294901760, %v2919_v58  ;;  %v4074_v50 = vld [vmem:[#allocation32_spill] sm:$0xff]  ;;  %v4085_v49 = vld [vmem:[#allocation42_spill] sm:$0xff] }
  0xca   : > { %v3418_v6 = vpack.c.bf16 %v4065_v63, %v4064_v56  ;;  %v4070_v15 = vand.u32 4294901760, %v2923_v60  ;;  %v4071_v35 = vand.u32 4294901760, %v2926_v2  ;;  %v4072_v36 = vand.u32 4294901760, %v2929_v22  ;;  %2327 = vmatpush1.bf16.msra.mxu1 %v2326_v13  ;;  %v4088_v56 = vld [vmem:[#allocation44_spill] sm:$0xff]  ;;  %v4090_v63 = vld [vmem:[#allocation45_spill] sm:$0xff] }
  0xcb   : > { %v3424_v11 = vpack.c.bf16 %v4067_v8, %v4066_v31  ;;  %v3430_v39 = vpack.c.bf16 %v4069_v14, %v4068_v12  ;;  %v4073_v45 = vand.u32 4294901760, %v2933_v37  ;;  %v4075_v26 = vand.u32 4294901760, %v4074_v50  ;;  %2329 = vmatprep.subr.bf16.mxu1 %v2328_v61  ;;  %v4095_v12 = vld [vmem:[#allocation48_spill] sm:$0xff] }
  0xcc   : > { %v3436_v32 = vpack.c.bf16 %v4071_v35, %v4070_v15  ;;  %v4077_v54 = vand.u32 4294901760, %v4076_v59  ;;  %v4078_v58 = vand.u32 4294901760, %v4043_v5  ;;  %v4079_v60 = vand.u32 4294901760, %v4044_v38  ;;  %2139 = vmatpush1.bf16.msra.mxu0 %v2138_v34  ;;  %v4093_v38 = vld [vmem:[#allocation47_spill] sm:$0xff]  ;;  %v4098_v35 = vld [vmem:[#allocation49_spill] sm:$0xff] }
  0xcd   : > { %v3442_v17 = vpack.c.bf16 %v4073_v45, %v4072_v36  ;;  %v4081_v42 = vand.u32 4294901760, %v4080_v41  ;;  %v4082_v22 = vand.u32 4294901760, %v4023_v52  ;;  %v4084_v9 = vand.u32 4294901760, %v4083_v47  ;;  %v4100_v45 = vld [vmem:[#allocation51_spill] sm:$0xff]  ;;  %2141 = vmatprep.subr.bf16.mxu0 %v2140_v28 }
  0xce   : > { %v3448_v40 = vpack.c.bf16 %v4077_v54, %v4075_v26  ;;  %v3454_v2 = vpack.c.bf16 %v4079_v60, %v4078_v58  ;;  %v4086_v48 = vand.u32 4294901760, %v4085_v49  ;;  %v4089_v13 = vand.u32 4294901760, %v4088_v56  ;;  %2331 = vmatpush1.bf16.msra.mxu1 %v2330_v57 }
  0xcf   : > { %v3460_v37 = vpack.c.bf16 %v4082_v22, %v4081_v42  ;;  %v4091_v5 = vand.u32 4294901760, %v4090_v63  ;;  %v4094_v8 = vand.u32 4294901760, %v4093_v38  ;;  %v4096_v14 = vand.u32 4294901760, %v4095_v12  ;;  %2333 = vmatprep.subr.bf16.mxu1 %v2332_v0 }
  0xd0   : > { %v3466_v53 = vpack.c.bf16 %v4086_v48, %v4084_v9  ;;  %v4099_v36 = vand.u32 4294901760, %v4098_v35  ;;  %v4101_v26 = vand.u32 4294901760, %v4100_v45  ;;  %v4103_v58 = vand.u32 4294901760, %v4031_v21  ;;  %v4110_v48 = vld [vmem:[#allocation60_spill] sm:$0xff]  ;;  %2143 = vmatpush1.bf16.msra.mxu0 %v2142_v43 }
  0xd1   : > { %v3472_v31 = vpack.c.bf16 %v4091_v5, %v4089_v13  ;;  %v3478_v15 = vpack.c.bf16 %v4096_v14, %v4094_v8  ;;  %v4104_v60 = vand.u32 4294901760, %v4032_v44  ;;  %v4106_v61 = vand.u32 4294901760, %v4033_v10  ;;  %v4113_v8 = vld [vmem:[#allocation61_spill] sm:$0xff]  ;;  %2145 = vmatprep.subr.bf16.mxu0 %v2144_v30 }
  0xd2   : > { %4087 = vst [vmem:[#allocation39_spill] sm:$0xff] %v3466_v53  ;;  %v3484_v54 = vpack.c.bf16 %v4101_v26, %v4099_v36  ;;  %v4107_v34 = vand.u32 4294901760, %v4034_v19  ;;  %v4109_v9 = vand.u32 4294901760, %v4035_v24  ;;  %v4111_v13 = vand.u32 4294901760, %v4110_v48 }
  0xd3   : > { %4092 = vst [vmem:[#allocation53_spill] sm:$0xff] %v3472_v31  ;;  %4097 = vst [vmem:[#allocation54_spill] sm:$0xff] %v3478_v15  ;;  %v3490_v42 = vpack.c.bf16 %v4104_v60, %v4103_v58  ;;  %v4114_v14 = vand.u32 4294901760, %v4113_v8  ;;  %v4115_v36 = vand.u32 4294901760, %v3010_v1  ;;  %v4117_v28 = vand.u32 4294901760, %v3014_v29 }
  0xd4   : > { %4102 = vst [vmem:[#allocation56_spill] sm:$0xff] %v3484_v54  ;;  %v3496_v22 = vpack.c.bf16 %v4107_v34, %v4106_v61  ;;  %v3502_v5 = vpack.c.bf16 %v4111_v13, %v4109_v9  ;;  %v4118_v58 = vand.u32 4294901760, %v3016_v46  ;;  %v4120_v61 = vand.u32 4294901760, %v3020_v55  ;;  %v4124_v13 = vld [vmem:[#allocation66_spill] sm:$0xff] }
  0xd5   : > { %4105 = vst [vmem:[#allocation57_spill] sm:$0xff] %v3490_v42  ;;  %v3508_v26 = vpack.c.bf16 %v4115_v36, %v4114_v14  ;;  %v4121_v34 = vand.u32 4294901760, %v3022_v3  ;;  %v4123_v9 = vand.u32 4294901760, %v3028_v33  ;;  %v4127_v14 = vld [vmem:[#allocation67_spill] sm:$0xff]  ;;  %v2148_v57 = vpack.c.bf16 %v4095_v12, %v4093_v38  ;;  %v4149_v38 = vld [vmem:[#allocation25_spill] sm:$0xff]  ;;  %v4150_v12 = vld [vmem:[#allocation26_spill] sm:$0xff] }
  0xd6   : > { %4108 = vst [vmem:[#allocation59_spill] sm:$0xff] %v3496_v22  ;;  %4112 = vst [vmem:[#allocation14_spill] sm:$0xff] %v3502_v5  ;;  %v3514_v60 = vpack.c.bf16 %v4118_v58, %v4117_v28  ;;  %v4125_v5 = vand.u32 4294901760, %v4124_v13  ;;  %v4128_v36 = vand.u32 4294901760, %v4127_v14  ;;  %v4131_v28 = vld [vmem:[#allocation71_spill] sm:$0xff]  ;;  %v2340_v0 = vpack.c.bf16 %v4100_v45, %v4098_v35  ;;  %v4153_v45 = vld [vmem:[#allocation29_spill] sm:$0xff] }
  0xd7   : > { %4116 = vst [vmem:[#allocation16_spill] sm:$0xff] %v3508_v26  ;;  %v3520_v22 = vpack.c.bf16 %v4121_v34, %v4120_v61  ;;  %v4129_v26 = vld [vmem:[#allocation69_spill] sm:$0xff]  ;;  %v4132_v58 = vand.u32 4294901760, %v4131_v28  ;;  %v2334_v61 = vpack.c.bf16 %v4076_v59, %v4074_v50  ;;  %v4135_v34 = vld [vmem:[#allocation74_spill] sm:$0xff]  ;;  %v2338_v50 = vpack.c.bf16 %v4090_v63, %v4088_v56  ;;  %v4147_v56 = vld [vmem:[#allocation24_spill] sm:$0xff] }
  0xd8   : > { %4119 = vst [vmem:[#allocation18_spill] sm:$0xff] %v3514_v60  ;;  %v3526_v42 = vpack.c.bf16 %v4125_v5, %v4123_v9  ;;  %v4130_v54 = vand.u32 4294901760, %v4129_v26  ;;  %v4133_v60 = vld [vmem:[#allocation72_spill] sm:$0xff]  ;;  %v4137_v5 = vld [vmem:[#allocation75_spill] sm:$0xff]  ;;  %v2150_v43 = vpack.c.bf16 %v4032_v44, %v4031_v21  ;;  %v2342_v30 = vpack.c.bf16 %v4034_v19, %v4033_v10 }
  0xd9   : > { %4122 = vst [vmem:[#allocation35_spill] sm:$0xff] %v3520_v22  ;;  %v4134_v15 = vand.u32 4294901760, %v4133_v60  ;;  %v4136_v22 = vand.u32 4294901760, %v4135_v34  ;;  %v4138_v9 = vand.u32 4294901760, %v4137_v5  ;;  %2335 = vmatpush1.bf16.msra.mxu1 %v2334_v61  ;;  %v2344_v59 = vpack.c.bf16 %v3010_v1, %v4113_v8  ;;  %v4139_v1 = vld [vmem:[#allocation11_spill] sm:$0xff]  ;;  %v4163_v61 = vld [vmem:[#allocation58_spill] sm:$0xff] }
  0xda   : > { %4126 = vst [vmem:[#allocation36_spill] sm:$0xff] %v3526_v42  ;;  %v3532_v31 = vpack.c.bf16 %v4130_v54, %v4128_v36  ;;  %v2336_v54 = vpack.c.bf16 %v4023_v52, %v4080_v41  ;;  %v2146_v36 = vpack.c.bf16 %v4085_v49, %v4083_v47  ;;  %v2152_v52 = vpack.c.bf16 %v4110_v48, %v4035_v24  ;;  %v4144_v24 = vld [vmem:[#allocation19_spill] sm:$0xff]  ;;  %v4145_v47 = vld [vmem:[#allocation21_spill] sm:$0xff]  ;;  %v4146_v49 = vld [vmem:[#allocation22_spill] sm:$0xff] }
  0xdb   : > { %v3538_v53 = vpack.c.bf16 %v4134_v15, %v4132_v58  ;;  %v3546_v42 = vpack.c.bf16 %v4138_v9, %v4136_v22  ;;  %v2154_v41 = vpack.c.bf16 %v3016_v46, %v3014_v29  ;;  %v2156_v21 = vpack.c.bf16 %v4124_v13, %v3028_v33  ;;  %v4140_v29 = vld [vmem:[#allocation77_spill] sm:$0xff]  ;;  %v4143_v33 = vld [vmem:[#allocation20_spill] sm:$0xff]  ;;  %v4148_v63 = vld [vmem:[#allocation23_spill] sm:$0xff] }
  0xdc   : > { %2337 = vmatprep.subr.bf16.mxu1 %v2336_v54  ;;  %2147 = vmatpush1.bf16.msra.mxu0 %v2146_v36  ;;  %v2346_v44 = vpack.c.bf16 %v3022_v3, %v3020_v55  ;;  %v2348_v10 = vpack.c.bf16 %v4129_v26, %v4127_v14  ;;  %v2158_v19 = vpack.c.bf16 %v4133_v60, %v4131_v28  ;;  %v4141_v55 = vld [vmem:[#allocation15_spill] sm:$0xff]  ;;  %v4142_v3 = vld [vmem:[#allocation17_spill] sm:$0xff]  ;;  %v4151_v15 = vld [vmem:[#allocation28_spill] sm:$0xff] }
  0xdd   : > { %2149 = vmatprep.subr.bf16.mxu0 %v2148_v57  ;;  %2339 = vmatpush1.bf16.msra.mxu1 %v2338_v50  ;;  %v2350_v46 = vpack.c.bf16 %v4137_v5, %v4135_v34  ;;  %v4152_v35 = vld [vmem:[#allocation27_spill] sm:$0xff]  ;;  %v4154_v22 = vld [vmem:[#allocation30_spill] sm:$0xff]  ;;  %v4158_v60 = vld [vmem:[#allocation40_spill] sm:$0xff] }
  0xde   : > { %2341 = vmatprep.subr.bf16.mxu1 %v2340_v0  ;;  %v4155_v48 = vld [vmem:[#allocation34_spill] sm:$0xff]  ;;  %v4156_v8 = vld [vmem:[#allocation31_spill] sm:$0xff]  ;;  %v4162_v58 = vld [vmem:[#allocation52_spill] sm:$0xff] }
  0xdf   : > { %v4157_v26 = vld [vmem:[#allocation38_spill] sm:$0xff]  ;;  %v4160_v14 = vld [vmem:[#allocation43_spill] sm:$0xff]  ;;  %v4167_v54 = vld [vmem:[#allocation65_spill] sm:$0xff] }
  0xe0   : > { %2151 = vmatpush1.bf16.msra.mxu0 %v2150_v43  ;;  %v4159_v13 = vld [vmem:[#allocation46_spill] sm:$0xff]  ;;  %v4164_v34 = vld [vmem:[#allocation55_spill] sm:$0xff]  ;;  %v4168_v36 = vld [vmem:[#allocation12_spill] sm:$0xff] }
  0xe1   : > { %2153 = vmatprep.subr.bf16.mxu0 %v2152_v52  ;;  %2343 = vmatpush1.bf16.msra.mxu1 %v2342_v30  ;;  %v4161_v28 = vld [vmem:[#allocation50_spill] sm:$0xff]  ;;  %v4166_v9 = vld [vmem:[#allocation63_spill] sm:$0xff]  ;;  %v4169_v57 = vand.u32 4294901760, %v4168_v36  ;;  %v4170_v50 = vld [vmem:[#allocation13_spill] sm:$0xff] }
  0xe2   : > { %2345 = vmatprep.subr.bf16.mxu1 %v2344_v59  ;;  %v4165_v5 = vld [vmem:[#allocation62_spill] sm:$0xff]  ;;  %v4171_v0 = vand.u32 4294901760, %v4170_v50  ;;  %v4172_v52 = vld [vmem:[#allocation64_spill] sm:$0xff] }
  0xe3   : > { %v4173_v30 = vld [vmem:[#allocation68_spill] sm:$0xff]  ;;  %v4174_v59 = vld [vmem:[#allocation70_spill] sm:$0xff] }
  0xe4   : > { %2155 = vmatpush1.bf16.msra.mxu0 %v2154_v41  ;;  %v2192_v43 = vpack.c.bf16 %v4171_v0, %v4169_v57  ;;  %v4175_v41 = vld [vmem:[#allocation73_spill] sm:$0xff] }
  0xe5   : > { %2157 = vmatprep.subr.bf16.mxu0 %v2156_v21  ;;  %2347 = vmatpush1.bf16.msra.mxu1 %v2346_v44  ;;  %v4176_v21 = vld [vmem:[#allocation78_spill] sm:$0xff] }
  0xe6   : > { %2349 = vmatprep.subr.bf16.mxu1 %v2348_v10 }
  0xe8   : > { %2159 = vmatpush1.bf16.msra.mxu0 %v2158_v19 }
  0xe9   : > { %2161 = vmatprep.subr.bf16.mxu0 %v4139_v1  ;;  %2351 = vmatpush1.bf16.msra.mxu1 %v2350_v46 }
  0xea   : > { %2353 = vmatprep.subr.bf16.mxu1 %v4141_v55 }
  0xeb   : > { %710 = vmatmul.mubr.f32.vlgmr.msra.gmra.mrb[0].mxu0 %v4140_v29 }
  0xec   : > { %2163 = vmatpush1.bf16.msra.mxu0 %v4142_v3  ;;  %812 = vmatprep.mubr.f32.mxu0 %v4045_v7 }
  0xed   : > { %2165 = vmatprep.subr.bf16.mxu0 %v4143_v33  ;;  %1565 = vmatmul.mubr.f32.vlgmr.msra.gmra.mrb[0].mxu1 %v4140_v29 }
  0xee   : > { %2355 = vmatpush1.bf16.msra.mxu1 %v4144_v24  ;;  %1667 = vmatprep.mubr.f32.mxu1 %v4045_v7 }
  0xef   : > { %2357 = vmatprep.subr.bf16.mxu1 %v4145_v47 }
  0xf0   : > { %2167 = vmatpush1.bf16.msra.mxu0 %v4146_v49 }
  0xf1   : > { %2169 = vmatprep.subr.bf16.mxu0 %v4147_v56 }
  0xf2   : > { %2359 = vmatpush1.bf16.msra.mxu1 %v4148_v63 }
  0xf3   : > { %2361 = vmatprep.subr.bf16.mxu1 %v4149_v38 }
  0xf4   : > { %2171 = vmatpush1.bf16.msra.mxu0 %v4150_v12 }
  0xf5   : > { %2173 = vmatprep.subr.bf16.mxu0 %v4151_v15 }
  0xf6   : > { %2363 = vmatpush1.bf16.msra.mxu1 %v4152_v35 }
  0xf7   : > { %2365 = vmatprep.subr.bf16.mxu1 %v4153_v45 }
  0xf8   : > { %2175 = vmatpush1.bf16.msra.mxu0 %v4154_v22 }
  0xf9   : > { %2177 = vmatprep.subr.bf16.mxu0 %v4155_v48 }
  0xfa   : > { %2367 = vmatpush1.bf16.msra.mxu1 %v4156_v8 }
  0xfb   : > { %2369 = vmatprep.subr.bf16.mxu1 %v4157_v26 }
  0xfc   : > { %2179 = vmatpush1.bf16.msra.mxu0 %v4158_v60 }
  0xfd   : > { %2181 = vmatprep.subr.bf16.mxu0 %v4159_v13 }
  0xfe   : > { %2371 = vmatpush1.bf16.msra.mxu1 %v4160_v14 }
  0xff   : > { %2373 = vmatprep.subr.bf16.mxu1 %v4161_v28 }
 0x100   : > { %2183 = vmatpush1.bf16.msra.mxu0 %v4162_v58 }
 0x101   : > { %2185 = vmatprep.subr.bf16.mxu0 %v4163_v61 }
 0x102   : > { %2375 = vmatpush1.bf16.msra.mxu1 %v4164_v34 }
 0x103   : > { %2377 = vmatprep.subr.bf16.mxu1 %v4165_v5 }
 0x104   : > { %2187 = vmatpush1.bf16.msra.mxu0 %v4166_v9 }
 0x105   : > { %2189 = vmatprep.subr.bf16.mxu0 %v4167_v54 }
 0x106   : > { %2379 = vmatpush1.bf16.msra.mxu1 %v4172_v52 }
 0x107   : > { %2381 = vmatprep.subr.bf16.mxu1 %v4173_v30 }
 0x108   : > { %2191 = vmatpush1.bf16.msra.mxu0 %v4174_v59 }
 0x109   : > { %2193 = vmatprep.subr.bf16.mxu0 %v2192_v43 }
 0x10a   : > { %2383 = vmatpush1.bf16.msra.mxu1 %v4175_v41 }
 0x10b   : > { %816 = vmatmul.mubr.f32.vlgmr.msra.gmra.mrb[0].mxu0 %v4176_v21  ;;  %2385 = vmatprep.subr.bf16.mxu1 %v3363_v25  ;;  %v4178_v25 = vld [vmem:[#allocation54_spill] sm:$0xff] }
 0x10c   : > { %2195 = vmatpush1.bf16.msra.mxu0 %v3370_v27  ;;  %982 = vmatprep.mubr.f32.mxu0 %v4045_v7  ;;  %v4177_v27 = vld [vmem:[#allocation39_spill] sm:$0xff] }
 0x10d   : > { %2197 = vmatprep.subr.bf16.mxu0 %v3382_v18  ;;  %1671 = vmatmul.mubr.f32.vlgmr.msra.gmra.mrb[0].mxu1 %v4176_v21  ;;  %v4180_v18 = vld [vmem:[#allocation56_spill] sm:$0xff] }
 0x10e   : > { %2387 = vmatpush1.bf16.msra.mxu1 %v3376_v20  ;;  %1837 = vmatprep.mubr.f32.mxu1 %v4045_v7  ;;  %v4179_v20 = vld [vmem:[#allocation53_spill] sm:$0xff] }
 0x10f   : > { %2389 = vmatprep.subr.bf16.mxu1 %v3388_v4  ;;  %v4181_v4 = vld [vmem:[#allocation57_spill] sm:$0xff] }
 0x110   : > { %2199 = vmatpush1.bf16.msra.mxu0 %v3394_v23  ;;  %v4182_v23 = vld [vmem:[#allocation14_spill] sm:$0xff] }
 0x111   : > { %2201 = vmatprep.subr.bf16.mxu0 %v3406_v51  ;;  %v4184_v51 = vld [vmem:[#allocation16_spill] sm:$0xff] }
 0x112   : > { %2391 = vmatpush1.bf16.msra.mxu1 %v3400_v16  ;;  %v4183_v16 = vld [vmem:[#allocation59_spill] sm:$0xff] }
 0x113   : > { %2393 = vmatprep.subr.bf16.mxu1 %v3412_v62  ;;  %v4185_v62 = vld [vmem:[#allocation18_spill] sm:$0xff] }
 0x114   : > { %2203 = vmatpush1.bf16.msra.mxu0 %v3418_v6  ;;  %v4186_v6 = vld [vmem:[#allocation36_spill] sm:$0xff] }
 0x115   : > { %2205 = vmatprep.subr.bf16.mxu0 %v3430_v39  ;;  %v4188_v39 = vld [vmem:[#allocation76_spill] sm:$0xff] }
 0x116   : > { %2395 = vmatpush1.bf16.msra.mxu1 %v3424_v11  ;;  %v4187_v11 = vld [vmem:[#allocation35_spill] sm:$0xff] }
 0x117   : > { %2397 = vmatprep.subr.bf16.mxu1 %v3436_v32 }
 0x118   : > { %2207 = vmatpush1.bf16.msra.mxu0 %v3442_v17 }
 0x119   : > { %2209 = vmatprep.subr.bf16.mxu0 %v3454_v2 }
 0x11a   : > { %2399 = vmatpush1.bf16.msra.mxu1 %v3448_v40 }
 0x11b   : > { %2401 = vmatprep.subr.bf16.mxu1 %v3460_v37 }
 0x11c   : > { %2211 = vmatpush1.bf16.msra.mxu0 %v4177_v27 }
 0x11d   : > { %2213 = vmatprep.subr.bf16.mxu0 %v4178_v25 }
 0x11e   : > { %2403 = vmatpush1.bf16.msra.mxu1 %v4179_v20 }
 0x11f   : > { %2405 = vmatprep.subr.bf16.mxu1 %v4180_v18 }
 0x120   : > { %2215 = vmatpush1.bf16.msra.mxu0 %v4181_v4 }
 0x121   : > { %2217 = vmatprep.subr.bf16.mxu0 %v4182_v23 }
 0x122   : > { %2407 = vmatpush1.bf16.msra.mxu1 %v4183_v16 }
 0x123   : > { %2409 = vmatprep.subr.bf16.mxu1 %v4184_v51 }
 0x124   : > { %2219 = vmatpush1.bf16.msra.mxu0 %v4185_v62 }
 0x125   : > { %2221 = vmatprep.subr.bf16.mxu0 %v4186_v6 }
 0x126   : > { %2411 = vmatpush1.bf16.msra.mxu1 %v4187_v11 }
 0x127   : > { %2413 = vmatprep.subr.bf16.mxu1 %v3532_v31 }
 0x128   : > { %2223 = vmatpush1.bf16.msra.mxu0 %v3538_v53 }
 0x129   : > { %2225 = vmatprep.subr.bf16.mxu0 %v4139_v1 }
 0x12a   : > { %2415 = vmatpush1.bf16.msra.mxu1 %v3546_v42 }
 0x12b   : > { %984 = vmatmul.mubr.f32.vlgmr.msra.gmra.mrb[0].mxu0 %v4188_v39  ;;  %2417 = vmatprep.subr.bf16.mxu1 %v4141_v55 }
 0x12c   : > { %2227 = vmatpush1.bf16.msra.mxu0 %v4142_v3  ;;  %1086 = vmatprep.mubr.f32.mxu0 %v4045_v7 }
 0x12d   : > { %2229 = vmatprep.subr.bf16.mxu0 %v4143_v33  ;;  %1839 = vmatmul.mubr.f32.vlgmr.msra.gmra.mrb[0].mxu1 %v4188_v39 }
 0x12e   : > { %2419 = vmatpush1.bf16.msra.mxu1 %v4144_v24  ;;  %1941 = vmatprep.mubr.f32.mxu1 %v4045_v7 }
 0x12f   : > { %2421 = vmatprep.subr.bf16.mxu1 %v4145_v47 }
 0x130   : > { %2231 = vmatpush1.bf16.msra.mxu0 %v4146_v49 }
 0x131   : > { %2233 = vmatprep.subr.bf16.mxu0 %v4147_v56 }
 0x132   : > { %2423 = vmatpush1.bf16.msra.mxu1 %v4148_v63 }
 0x133   : > { %2425 = vmatprep.subr.bf16.mxu1 %v4149_v38 }
 0x134   : > { %2235 = vmatpush1.bf16.msra.mxu0 %v4150_v12 }
 0x135   : > { %2237 = vmatprep.subr.bf16.mxu0 %v4151_v15 }
 0x136   : > { %2427 = vmatpush1.bf16.msra.mxu1 %v4152_v35 }
 0x137   : > { %2429 = vmatprep.subr.bf16.mxu1 %v4153_v45 }
 0x138   : > { %2239 = vmatpush1.bf16.msra.mxu0 %v4154_v22 }
 0x139   : > { %2241 = vmatprep.subr.bf16.mxu0 %v4155_v48 }
 0x13a   : > { %2431 = vmatpush1.bf16.msra.mxu1 %v4156_v8 }
 0x13b   : > { %2433 = vmatprep.subr.bf16.mxu1 %v4157_v26 }
 0x13c   : > { %2243 = vmatpush1.bf16.msra.mxu0 %v4158_v60 }
 0x13d   : > { %2245 = vmatprep.subr.bf16.mxu0 %v4159_v13 }
 0x13e   : > { %2435 = vmatpush1.bf16.msra.mxu1 %v4160_v14 }
 0x13f   : > { %2437 = vmatprep.subr.bf16.mxu1 %v4161_v28 }
 0x140   : > { %2247 = vmatpush1.bf16.msra.mxu0 %v4162_v58 }
 0x141   : > { %2249 = vmatprep.subr.bf16.mxu0 %v4163_v61 }
 0x142   : > { %2439 = vmatpush1.bf16.msra.mxu1 %v4164_v34 }
 0x143   : > { %2441 = vmatprep.subr.bf16.mxu1 %v4165_v5 }
 0x144   : > { %2251 = vmatpush1.bf16.msra.mxu0 %v4166_v9 }
 0x145   : > { %2253 = vmatprep.subr.bf16.mxu0 %v4167_v54 }
 0x146   : > { %2443 = vmatpush1.bf16.msra.mxu1 %v4172_v52 }
 0x147   : > { %2445 = vmatprep.subr.bf16.mxu1 %v4173_v30 }
 0x148   : > { %2255 = vmatpush1.bf16.msra.mxu0 %v4174_v59 }
 0x14a   : > { %2447 = vmatpush1.bf16.msra.mxu1 %v4175_v41 }
 0x14b   : > { %1088 = vmatmul.mubr.f32.vlgmr.msra.gmra.mrb[0].mxu0 %v4188_v39 }
 0x14d   : > { %1943 = vmatmul.mubr.f32.vlgmr.msra.gmra.mrb[0].mxu1 %v4188_v39 }
 0x21e   : > { %v1089_v7 = vpop.f32.mrb[0].mxu0 }
 0x21f   : > { %1949 = vst [vmem:[%s173_s17] sm:$0xff] %v1089_v7  ;;  %v1091_v32 = vpop.f32.mrb[1].mxu0 }
 0x220   : > { %1950 = vst [vmem:[%s173_s17 + $0x8] sm:$0xff] %v1091_v32  ;;  %v1944_v17 = vpop.f32.mrb[0].mxu1 }
 0x221   : > { %1951 = vst [vmem:[%s173_s17 + $0x10] sm:$0xff] %v1944_v17  ;;  %v1946_v40 = vpop.f32.mrb[1].mxu1 }
 0x222   : > { %1952 = vst [vmem:[%s173_s17 + $0x18] sm:$0xff] %v1946_v40 }
 0x223   : > { %2599 = shalt.err (!%p2596_p7)
}
 0x224   : > { %s2600_s7 = scalar_lea.hbm %s3698_s30, 512  ;;  %s2604_s25 = scalar_lea.hbm %s3742_s2, 1024 }
 0x225   : > { %p2601_p9 = scmp.ne.s32.totalorder %s3698_s30, %s2600_s7  ;;  %p2605_p0 = scmp.lt.u32.totalorder %s3698_s30, %s3742_s2 }
 0x226   : > { %p2606_p11 = scmp.lt.u32.totalorder %s2604_s25, %s2600_s7  ;;  %p2608_p4 = scmp.lt.u32.totalorder %s2600_s7, %s3698_s30 }
 0x227   : > { %p2602_p2 = pnand %p2601_p9, %p2770_p12 }
 0x228   : > { %p2607_p1 = por %p2606_p11, %p2605_p0 }
 0x229   : > { %p2603_p5 = pneg %p2602_p2 }
 0x22a   : > { %p2609_p6 = por %p2608_p4, %p2607_p1 }
 0x22c   : > { %p2610_p8 = pnand %p2609_p6, %p2603_p5 }
 0x22e   : > { %2613 = shalt.err (!%p2610_p8)
}
 0x22f   : > { %2474 = dma.vmem_to_hbm [thread:$0]  (%p2770_p12), %s3693_s27, 512, %s3698_s30, %s1954_s3  }
 0x230 PF: > { %s1980_s19 = sand.u32 1, %s2644_s9   ;;  %p4189_p10 = scmp.ne.s32.totalorder %s3943_s16, 0 }
 0x231   : > { %p4190_p13 = scmp.ge.s32.totalorder %s2656_s12, 2  ;;  %s1981_s29 = scalar_lea.sflag [#allocation4], %s1980_s19 }
 0x233   : > { %p2485_p3 = pnand %p4190_p13, %p4189_p10 }
 0x235   : > { %2639 = dma.done.wait (!%p2485_p3), %s1981_s29, 512  }
 0x236   : > { %2641 = vsyncadd (!%p2485_p3), %s1981_s29, 4294966784  ;;  %p16_p7 = scmp.ge.s32.totalorder %s2735_s21, 4   ;;  %s4191_s9 = smov %s2648_s10 }
 0x237   : > { %s4192_s10 = smov %s2652_s11  ;;  %s4193_s11 = smov %s2766_s8 }
 0x238   : > { %s4194_s12 = smov %s2735_s21  ;;  %18 = sbr.rel (!%p16_p7) target bundleno = 6 (0x6), region = 77 }
 0x23f   :  { %1986 = vsyncpa [#allocation3], 1 }
 0x240   :  { %1988 = vsyncpa [#allocation3 + $0x1], 1 }
 0x241   :  { %1989 = vsyncpa [#allocation6], 1 }
 0x242   :  { %1990 = vsyncpa [#allocation4], 1 }
 0x243   :  { %1992 = vsyncpa [#allocation4 + $0x1], 1 }

</bundles_post_ra>
